<compile_context>
chip_gen: v6e
topology: v6e:2x2x1
jax: 0.10.0
libtpu: 0.0.40
codegen_flags: <defaults>
</compile_context>

<pallas_src>
import jax
import jax.numpy as jnp
from jax.experimental import pallas as pl
from jax.experimental.pallas import tpu as pltpu


# ---------------------------------------------------------------------------
# Kernel 1: fused im2col-matmul conv + bias + ReLU + global average pool.
# Each grid step processes `imgs_per_step` whole images and writes their
# pooled (imgs_per_step, F) features directly.
# ---------------------------------------------------------------------------
def conv_pool_kernel(p_ref, w_ref, b_ref, o_ref):
    # p_ref: (imgs_per_step*HW, Kpad) bf16, w_ref: (Kpad, F) bf16
    # b_ref: (1, F) f32, o_ref: (1, imgs_per_step, F) f32
    nimg = o_ref.shape[1]
    feat = o_ref.shape[2]
    hw = p_ref.shape[0] // nimg
    # bf16 MXU matmul, f32 accumulate
    acc = jnp.dot(p_ref[...], w_ref[...], preferred_element_type=jnp.float32)
    # f32 VPU epilogue (bias + ReLU)
    acc = jnp.maximum(acc + b_ref[...], 0.0)
    # per-image mean over the HW spatial axis (leading-dim split: no relayout)
    pooled = jnp.mean(acc.reshape(nimg, hw, feat), axis=1)     # (nimg, F) f32
    o_ref[...] = pooled[None]


def conv_relu_pool(patches, w, b, *, B, HW, imgs_per_step):
    M, Kp = patches.shape
    _, F = w.shape
    assert B % imgs_per_step == 0, "image tile must divide the batch"
    assert M == B * HW, "patch rows must be B*H*W"
    n_steps = B // imgs_per_step
    tm = imgs_per_step * HW                      # whole images per grid step
    out = pl.pallas_call(
        conv_pool_kernel,
        out_shape=jax.ShapeDtypeStruct((n_steps, imgs_per_step, F), jnp.float32),
        grid=(n_steps,),
        in_specs=[
            pl.BlockSpec((tm, Kp), lambda i: (i, 0)),
            pl.BlockSpec((Kp, F), lambda i: (0, 0)),
            pl.BlockSpec((1, F), lambda i: (0, 0)),
        ],
        out_specs=pl.BlockSpec((1, imgs_per_step, F), lambda i: (i, 0, 0)),
        compiler_params=pltpu.CompilerParams(dimension_semantics=("parallel",)),
    )(patches, w, b)
    return out.reshape(B, F)


# ---------------------------------------------------------------------------
# Kernel 2: fused SimCLR projection head
#   h = x @ W1 + b1 ; BatchNorm1d (batch statistics, eps=1e-5) ; ReLU ;
#   z = h @ W2 + b2
# NOTE: the whole batch lives in a single block (grid=(1,)), so the BatchNorm
# batch statistics are exact. Do not tile the batch axis without adding a
# cross-tile reduction.
# ---------------------------------------------------------------------------
def proj_head_kernel(x_ref, w1_ref, b1_ref, g_ref, be_ref, w2_ref, b2_ref,
                     z_ref):
    x16 = x_ref[...].astype(jnp.bfloat16)                      # bf16 MXU input
    h = jnp.dot(x16, w1_ref[...],
                preferred_element_type=jnp.float32) + b1_ref[...]
    # BatchNorm (training-mode, biased variance) in f32 on the VPU
    mean = jnp.mean(h, axis=0, keepdims=True)
    var = jnp.mean((h - mean) ** 2, axis=0, keepdims=True)
    hn = (h - mean) * jax.lax.rsqrt(var + 1e-5) * g_ref[...] + be_ref[...]
    hn = jnp.maximum(hn, 0.0)
    z_ref[...] = jnp.dot(hn.astype(jnp.bfloat16), w2_ref[...],
                         preferred_element_type=jnp.float32) + b2_ref[...]


def projection_head(x, w1, b1, gamma, beta, w2, b2):
    B, F = x.shape
    _, HID = w1.shape
    _, OUT = w2.shape
    return pl.pallas_call(
        proj_head_kernel,
        out_shape=jax.ShapeDtypeStruct((B, OUT), jnp.float32),
        grid=(1,),
        in_specs=[
            pl.BlockSpec((B, F), lambda i: (0, 0)),
            pl.BlockSpec((F, HID), lambda i: (0, 0)),
            pl.BlockSpec((1, HID), lambda i: (0, 0)),
            pl.BlockSpec((1, HID), lambda i: (0, 0)),
            pl.BlockSpec((1, HID), lambda i: (0, 0)),
            pl.BlockSpec((HID, OUT), lambda i: (0, 0)),
            pl.BlockSpec((1, OUT), lambda i: (0, 0)),
        ],
        out_specs=pl.BlockSpec((B, OUT), lambda i: (0, 0)),
    )(x, w1, b1, gamma, beta, w2, b2)


# ---------------------------------------------------------------------------
# Glue: im2col patch extraction (layout plumbing only, no hot compute)
# TODO(synk): for production C/H/W, do the 3x3 conv as 9 shifted
# matmul-accumulates inside the kernel to avoid the 9x im2col HBM duplication.
# ---------------------------------------------------------------------------
def im2col(x, k=3, pad=1):
    # x: (B, C, H, W) NCHW -> (B*H*W, C*k*k), channel-major / kernel-pos-minor
    B, C, H, W = x.shape
    xp = jnp.pad(x, ((0, 0), (0, 0), (pad, pad), (pad, pad)))
    slabs = []
    for di in range(k):
        for dj in range(k):
            slabs.append(xp[:, :, di:di + H, dj:dj + W])
    p = jnp.stack(slabs, axis=0)          # (k*k, B, C, H, W)
    p = p.transpose(1, 3, 4, 2, 0)        # (B, H, W, C, k*k)
    return p.reshape(B * H * W, C * k * k)


def dcl_forward(x, params):
    """Returns (features, z) exactly as DCL.forward does."""
    B, C, H, W = x.shape
    HW = H * W
    k = 3

    patches = im2col(x, k=k, pad=1)                      # (B*HW, C*9) f32
    Kdim = patches.shape[1]
    Kp = ((Kdim + 127) // 128) * 128                     # pad contraction dim
    patches = jnp.pad(patches, ((0, 0), (0, Kp - Kdim))).astype(jnp.bfloat16)
    w_conv = jnp.pad(params["w_conv"],
                     ((0, Kp - Kdim), (0, 0))).astype(jnp.bfloat16)

    # Whole-image tiles (~1024 patch rows per step); keep >=2 steps when
    # possible so the "parallel" axis feeds both v7x TensorCores.
    imgs_per_step = max(1, min(B, 1024 // HW))
    while B % imgs_per_step:
        imgs_per_step -= 1

    feats = conv_relu_pool(patches, w_conv, params["b_conv"],
                           B=B, HW=HW, imgs_per_step=imgs_per_step)
    z = projection_head(feats,
                        params["w1"].astype(jnp.bfloat16), params["b1"],
                        params["gamma"], params["beta"],
                        params["w2"].astype(jnp.bfloat16), params["b2"])
    return feats, z


# ---------------------------------------------------------------------------
# Pure-JAX reference with matching bf16 MXU-input casts (for a sanity check)
# ---------------------------------------------------------------------------
def dcl_reference(x, params):
    B, C, H, W = x.shape
    HW = H * W
    F = params["w_conv"].shape[1]
    patches = im2col(x, k=3, pad=1)
    conv = jnp.maximum(
        jnp.dot(patches.astype(jnp.bfloat16),
                params["w_conv"].astype(jnp.bfloat16),
                preferred_element_type=jnp.float32) + params["b_conv"], 0.0)
    feats = jnp.mean(conv.reshape(B, HW, F), axis=1)
    h = jnp.dot(feats.astype(jnp.bfloat16), params["w1"].astype(jnp.bfloat16),
                preferred_element_type=jnp.float32) + params["b1"]
    mean = jnp.mean(h, axis=0, keepdims=True)
    var = jnp.mean((h - mean) ** 2, axis=0, keepdims=True)
    hn = jnp.maximum((h - mean) * jax.lax.rsqrt(var + 1e-5) * params["gamma"]
                     + params["beta"], 0.0)
    z = jnp.dot(hn.astype(jnp.bfloat16), params["w2"].astype(jnp.bfloat16),
                preferred_element_type=jnp.float32) + params["b2"]
    return feats, z


if __name__ == "__main__":
    key = jax.random.PRNGKey(0)
    B, C, H, W = 8, 4, 16, 16
    F = 256           # out_feature (backbone feature dim)
    HID, OUT = 512, 128
    k = 3

    keys = jax.random.split(key, 6)
    x = jax.random.normal(keys[0], (B, C, H, W), jnp.float32)

    params = {
        "w_conv": jax.random.normal(keys[1], (C * k * k, F), jnp.float32) * 0.1,
        "b_conv": jax.random.normal(keys[2], (1, F), jnp.float32) * 0.01,
        "w1": jax.random.normal(keys[3], (F, HID), jnp.float32) / jnp.sqrt(F * 1.0),
        "b1": jnp.zeros((1, HID), jnp.float32),
        "gamma": jnp.ones((1, HID), jnp.float32),
        "beta": jnp.zeros((1, HID), jnp.float32),
        "w2": jax.random.normal(keys[4], (HID, OUT), jnp.float32) / jnp.sqrt(HID * 1.0),
        "b2": jnp.zeros((1, OUT), jnp.float32),
    }

    feats, z = jax.jit(dcl_forward)(x, params)
    jax.block_until_ready((feats, z))

    feats_ref, z_ref = jax.jit(dcl_reference)(x, params)
    jax.block_until_ready((feats_ref, z_ref))

    assert feats.shape == (B, F), feats.shape
    assert z.shape == (B, OUT), z.shape
    assert feats.dtype == jnp.float32 and z.dtype == jnp.float32
    assert bool(jnp.all(jnp.isfinite(feats))) and bool(jnp.all(jnp.isfinite(z)))
    assert bool(jnp.allclose(feats, feats_ref, atol=1e-2, rtol=1e-2)), \
        float(jnp.max(jnp.abs(feats - feats_ref)))
    assert bool(jnp.allclose(z, z_ref, atol=1e-1, rtol=1e-1)), \
        float(jnp.max(jnp.abs(z - z_ref)))
    print("KERNEL_OK")
</pallas_src>

<mosaic_0001>
module attributes {stable_mosaic.version = 11 : i64} {
  func.func @conv_pool_kernel(%arg0: i32, %arg1: memref<1024x128xbf16, #tpu.memory_space<vmem>>, %arg2: memref<128x256xbf16, #tpu.memory_space<vmem>>, %arg3: memref<1x256xf32, #tpu.memory_space<vmem>>, %arg4: memref<1x4x256xf32, #tpu.memory_space<vmem>>) attributes {dimension_semantics = [#tpu.dimension_semantics<parallel>], iteration_bounds = array<i64: 2>, scalar_prefetch = 0 : i64, scratch_operands = 0 : i64, tpu.core_type = #tpu.core_type<tc>, window_params = [{transform_indices = @transform_0, window_bounds = array<i64: 1024, 128>}, {pipeline_mode = #tpu.pipeline_mode<synchronous>, transform_indices = @transform_1, window_bounds = array<i64: 128, 256>}, {pipeline_mode = #tpu.pipeline_mode<synchronous>, transform_indices = @transform_2, window_bounds = array<i64: 1, 256>}, {transform_indices = @transform_3, window_bounds = array<i64: 1, 4, 256>}]} {
    %c0 = arith.constant 0 : index
    %c0_0 = arith.constant 0 : index
    %0 = vector.load %arg1[%c0, %c0_0] : memref<1024x128xbf16, #tpu.memory_space<vmem>>, vector<1024x128xbf16>
    %c0_1 = arith.constant 0 : index
    %c0_2 = arith.constant 0 : index
    %1 = vector.load %arg2[%c0_1, %c0_2] : memref<128x256xbf16, #tpu.memory_space<vmem>>, vector<128x256xbf16>
    %cst = arith.constant dense<0.000000e+00> : vector<1024x256xf32>
    %2 = tpu.matmul %0, %1, %cst {dimension_numbers = #tpu.dot_dimension_numbers<[1], [0], [0], [1], [0, 0, 1, 1], [], []>} : vector<1024x128xbf16>, vector<128x256xbf16>, vector<1024x256xf32> -> vector<1024x256xf32>
    %c0_3 = arith.constant 0 : index
    %c0_4 = arith.constant 0 : index
    %3 = vector.load %arg3[%c0_3, %c0_4] : memref<1x256xf32, #tpu.memory_space<vmem>>, vector<1x256xf32>
    %4 = vector.broadcast %3 : vector<1x256xf32> to vector<1024x256xf32>
    %5 = arith.addf %2, %4 : vector<1024x256xf32>
    %cst_5 = arith.constant 0.000000e+00 : f32
    %6 = vector.broadcast %cst_5 : f32 to vector<1024x256xf32>
    %7 = arith.maximumf %5, %6 : vector<1024x256xf32>
    %8 = vector.shape_cast %7 : vector<1024x256xf32> to vector<4x256x256xf32>
    %cst_6 = arith.constant dense<0.000000e+00> : vector<4x256xf32>
    %9 = vector.multi_reduction <add>, %8, %cst_6 [1] : vector<4x256x256xf32> to vector<4x256xf32>
    %cst_7 = arith.constant 2.560000e+02 : f32
    %10 = vector.broadcast %cst_7 : f32 to vector<4x256xf32>
    %11 = arith.divf %9, %10 : vector<4x256xf32>
    %12 = vector.shape_cast %11 : vector<4x256xf32> to vector<1x4x256xf32>
    %c0_8 = arith.constant 0 : index
    %c0_9 = arith.constant 0 : index
    %c0_10 = arith.constant 0 : index
    %13 = vector.load %arg4[%c0_8, %c0_9, %c0_10] : memref<1x4x256xf32, #tpu.memory_space<vmem>>, vector<1x4x256xf32>
    tpu.vector_store %arg4[%c0_8, %c0_9, %c0_10], %12 {strides = array<i32>} : memref<1x4x256xf32, #tpu.memory_space<vmem>>, vector<1x4x256xf32>,
    return
  }
  func.func @transform_0(%arg0: i32) -> (i32, i32) {
    %c0_i32 = arith.constant 0 : i32
    %c0_i32_0 = arith.constant 0 : i32
    return %arg0, %c0_i32 : i32, i32
  }
  func.func @transform_1(%arg0: i32) -> (i32, i32) {
    %c0_i32 = arith.constant 0 : i32
    %c0_i32_0 = arith.constant 0 : i32
    %c0_i32_1 = arith.constant 0 : i32
    return %c0_i32, %c0_i32_0 : i32, i32
  }
  func.func @transform_2(%arg0: i32) -> (i32, i32) {
    %c0_i32 = arith.constant 0 : i32
    %c0_i32_0 = arith.constant 0 : i32
    %c0_i32_1 = arith.constant 0 : i32
    return %c0_i32, %c0_i32_0 : i32, i32
  }
  func.func @transform_3(%arg0: i32) -> (i32, i32, i32) {
    %c0_i32 = arith.constant 0 : i32
    %c0_i32_0 = arith.constant 0 : i32
    %c0_i32_1 = arith.constant 0 : i32
    return %arg0, %c0_i32, %c0_i32_0 : i32, i32, i32
  }
}

module attributes {stable_mosaic.version = 11 : i64} {
  func.func @proj_head_kernel(%arg0: i32, %arg1: memref<8x256xf32, #tpu.memory_space<vmem>>, %arg2: memref<256x512xbf16, #tpu.memory_space<vmem>>, %arg3: memref<1x512xf32, #tpu.memory_space<vmem>>, %arg4: memref<1x512xf32, #tpu.memory_space<vmem>>, %arg5: memref<1x512xf32, #tpu.memory_space<vmem>>, %arg6: memref<512x128xbf16, #tpu.memory_space<vmem>>, %arg7: memref<1x128xf32, #tpu.memory_space<vmem>>, %arg8: memref<8x128xf32, #tpu.memory_space<vmem>>) attributes {dimension_semantics = [#tpu.dimension_semantics<arbitrary>], iteration_bounds = array<i64: 1>, scalar_prefetch = 0 : i64, scratch_operands = 0 : i64, tpu.core_type = #tpu.core_type<tc>, window_params = [{pipeline_mode = #tpu.pipeline_mode<synchronous>, transform_indices = @transform_0, window_bounds = array<i64: 8, 256>}, {pipeline_mode = #tpu.pipeline_mode<synchronous>, transform_indices = @transform_1, window_bounds = array<i64: 256, 512>}, {pipeline_mode = #tpu.pipeline_mode<synchronous>, transform_indices = @transform_2, window_bounds = array<i64: 1, 512>}, {pipeline_mode = #tpu.pipeline_mode<synchronous>, transform_indices = @transform_3, window_bounds = array<i64: 1, 512>}, {pipeline_mode = #tpu.pipeline_mode<synchronous>, transform_indices = @transform_4, window_bounds = array<i64: 1, 512>}, {pipeline_mode = #tpu.pipeline_mode<synchronous>, transform_indices = @transform_5, window_bounds = array<i64: 512, 128>}, {pipeline_mode = #tpu.pipeline_mode<synchronous>, transform_indices = @transform_6, window_bounds = array<i64: 1, 128>}, {pipeline_mode = #tpu.pipeline_mode<synchronous>, transform_indices = @transform_7, window_bounds = array<i64: 8, 128>}]} {
    %c0 = arith.constant 0 : index
    %c0_0 = arith.constant 0 : index
    %0 = vector.load %arg1[%c0, %c0_0] : memref<8x256xf32, #tpu.memory_space<vmem>>, vector<8x256xf32>
    %1 = arith.truncf %0 : vector<8x256xf32> to vector<8x256xbf16>
    %c0_1 = arith.constant 0 : index
    %c0_2 = arith.constant 0 : index
    %2 = vector.load %arg2[%c0_1, %c0_2] : memref<256x512xbf16, #tpu.memory_space<vmem>>, vector<256x512xbf16>
    %cst = arith.constant dense<0.000000e+00> : vector<8x512xf32>
    %3 = tpu.matmul %1, %2, %cst {dimension_numbers = #tpu.dot_dimension_numbers<[1], [0], [0], [1], [0, 0, 1, 1], [], []>} : vector<8x256xbf16>, vector<256x512xbf16>, vector<8x512xf32> -> vector<8x512xf32>
    %c0_3 = arith.constant 0 : index
    %c0_4 = arith.constant 0 : index
    %4 = vector.load %arg3[%c0_3, %c0_4] : memref<1x512xf32, #tpu.memory_space<vmem>>, vector<1x512xf32>
    %5 = vector.broadcast %4 : vector<1x512xf32> to vector<8x512xf32>
    %6 = arith.addf %3, %5 : vector<8x512xf32>
    %cst_5 = arith.constant dense<0.000000e+00> : vector<512xf32>
    %7 = vector.multi_reduction <add>, %6, %cst_5 [0] : vector<8x512xf32> to vector<512xf32>
    %8 = vector.shape_cast %7 : vector<512xf32> to vector<1x512xf32>
    %cst_6 = arith.constant 8.000000e+00 : f32
    %9 = vector.broadcast %cst_6 : f32 to vector<1x512xf32>
    %10 = arith.divf %8, %9 : vector<1x512xf32>
    %11 = vector.broadcast %10 : vector<1x512xf32> to vector<8x512xf32>
    %12 = arith.subf %6, %11 : vector<8x512xf32>
    %13 = arith.mulf %12, %12 : vector<8x512xf32>
    %cst_7 = arith.constant dense<0.000000e+00> : vector<512xf32>
    %14 = vector.multi_reduction <add>, %13, %cst_7 [0] : vector<8x512xf32> to vector<512xf32>
    %15 = vector.shape_cast %14 : vector<512xf32> to vector<1x512xf32>
    %cst_8 = arith.constant 8.000000e+00 : f32
    %16 = vector.broadcast %cst_8 : f32 to vector<1x512xf32>
    %17 = arith.divf %15, %16 : vector<1x512xf32>
    %18 = vector.broadcast %10 : vector<1x512xf32> to vector<8x512xf32>
    %19 = arith.subf %6, %18 : vector<8x512xf32>
    %cst_9 = arith.constant 9.99999974E-6 : f32
    %20 = vector.broadcast %cst_9 : f32 to vector<1x512xf32>
    %21 = arith.addf %17, %20 : vector<1x512xf32>
    %22 = math.rsqrt %21 : vector<1x512xf32>
    %23 = vector.broadcast %22 : vector<1x512xf32> to vector<8x512xf32>
    %24 = arith.mulf %19, %23 : vector<8x512xf32>
    %c0_10 = arith.constant 0 : index
    %c0_11 = arith.constant 0 : index
    %25 = vector.load %arg4[%c0_10, %c0_11] : memref<1x512xf32, #tpu.memory_space<vmem>>, vector<1x512xf32>
    %26 = vector.broadcast %25 : vector<1x512xf32> to vector<8x512xf32>
    %27 = arith.mulf %24, %26 : vector<8x512xf32>
    %c0_12 = arith.constant 0 : index
    %c0_13 = arith.constant 0 : index
    %28 = vector.load %arg5[%c0_12, %c0_13] : memref<1x512xf32, #tpu.memory_space<vmem>>, vector<1x512xf32>
    %29 = vector.broadcast %28 : vector<1x512xf32> to vector<8x512xf32>
    %30 = arith.addf %27, %29 : vector<8x512xf32>
    %cst_14 = arith.constant 0.000000e+00 : f32
    %31 = vector.broadcast %cst_14 : f32 to vector<8x512xf32>
    %32 = arith.maximumf %30, %31 : vector<8x512xf32>
    %33 = arith.truncf %32 : vector<8x512xf32> to vector<8x512xbf16>
    %c0_15 = arith.constant 0 : index
    %c0_16 = arith.constant 0 : index
    %34 = vector.load %arg6[%c0_15, %c0_16] : memref<512x128xbf16, #tpu.memory_space<vmem>>, vector<512x128xbf16>
    %cst_17 = arith.constant dense<0.000000e+00> : vector<8x128xf32>
    %35 = tpu.matmul %33, %34, %cst_17 {dimension_numbers = #tpu.dot_dimension_numbers<[1], [0], [0], [1], [0, 0, 1, 1], [], []>} : vector<8x512xbf16>, vector<512x128xbf16>, vector<8x128xf32> -> vector<8x128xf32>
    %c0_18 = arith.constant 0 : index
    %c0_19 = arith.constant 0 : index
    %36 = vector.load %arg7[%c0_18, %c0_19] : memref<1x128xf32, #tpu.memory_space<vmem>>, vector<1x128xf32>
    %37 = vector.broadcast %36 : vector<1x128xf32> to vector<8x128xf32>
    %38 = arith.addf %35, %37 : vector<8x128xf32>
    %c0_20 = arith.constant 0 : index
    %c0_21 = arith.constant 0 : index
    %39 = vector.load %arg8[%c0_20, %c0_21] : memref<8x128xf32, #tpu.memory_space<vmem>>, vector<8x128xf32>
    tpu.vector_store %arg8[%c0_20, %c0_21], %38 {strides = array<i32>} : memref<8x128xf32, #tpu.memory_space<vmem>>, vector<8x128xf32>,
    return
  }
  func.func @transform_0(%arg0: i32) -> (i32, i32) {
    %c0_i32 = arith.constant 0 : i32
    %c0_i32_0 = arith.constant 0 : i32
    %c0_i32_1 = arith.constant 0 : i32
    return %c0_i32, %c0_i32_0 : i32, i32
  }
  func.func @transform_1(%arg0: i32) -> (i32, i32) {
    %c0_i32 = arith.constant 0 : i32
    %c0_i32_0 = arith.constant 0 : i32
    %c0_i32_1 = arith.constant 0 : i32
    return %c0_i32, %c0_i32_0 : i32, i32
  }
  func.func @transform_2(%arg0: i32) -> (i32, i32) {
    %c0_i32 = arith.constant 0 : i32
    %c0_i32_0 = arith.constant 0 : i32
    %c0_i32_1 = arith.constant 0 : i32
    return %c0_i32, %c0_i32_0 : i32, i32
  }
  func.func @transform_3(%arg0: i32) -> (i32, i32) {
    %c0_i32 = arith.constant 0 : i32
    %c0_i32_0 = arith.constant 0 : i32
    %c0_i32_1 = arith.constant 0 : i32
    return %c0_i32, %c0_i32_0 : i32, i32
  }
  func.func @transform_4(%arg0: i32) -> (i32, i32) {
    %c0_i32 = arith.constant 0 : i32
    %c0_i32_0 = arith.constant 0 : i32
    %c0_i32_1 = arith.constant 0 : i32
    return %c0_i32, %c0_i32_0 : i32, i32
  }
  func.func @transform_5(%arg0: i32) -> (i32, i32) {
    %c0_i32 = arith.constant 0 : i32
    %c0_i32_0 = arith.constant 0 : i32
    %c0_i32_1 = arith.constant 0 : i32
    return %c0_i32, %c0_i32_0 : i32, i32
  }
  func.func @transform_6(%arg0: i32) -> (i32, i32) {
    %c0_i32 = arith.constant 0 : i32
    %c0_i32_0 = arith.constant 0 : i32
    %c0_i32_1 = arith.constant 0 : i32
    return %c0_i32, %c0_i32_0 : i32, i32
  }
  func.func @transform_7(%arg0: i32) -> (i32, i32) {
    %c0_i32 = arith.constant 0 : i32
    %c0_i32_0 = arith.constant 0 : i32
    %c0_i32_1 = arith.constant 0 : i32
    return %c0_i32, %c0_i32_0 : i32, i32
  }
}

</mosaic_0001>

<bundles_post_ra>
// kernel: dcl_forward.3
= control target key start
LH: loop header
LB: loop body
LE: loop exit
PB: predicated region body
PF: predicated region fallthrough
CT: control target
= control target key end

     0   :  { %s1685_s0 = inlined_call_operand.vmem [shape: f32[8,256], index: 0, kind: input, shape index: {}]   ;;  %s1686_s1 = inlined_call_operand.vmem [shape: bf16[256,512], index: 1, kind: input, shape index: {}]   ;;  %s1687_s2 = inlined_call_operand.vmem [shape: f32[1,512], index: 2, kind: input, shape index: {}]   ;;  %s1688_s3 = inlined_call_operand.vmem [shape: f32[1,512], index: 3, kind: input, shape index: {}]   ;;  %s1689_s4 = inlined_call_operand.vmem [shape: f32[1,512], index: 4, kind: input, shape index: {}]   ;;  %s1690_s5 = inlined_call_operand.vmem [shape: bf16[512,128], index: 5, kind: input, shape index: {}]   ;;  %s1691_s6 = inlined_call_operand.vmem [shape: f32[1,128], index: 6, kind: input, shape index: {}]   ;;  %s1692_s7 = inlined_call_operand.hbm [shape: f32[8,128], index: 7, kind: output, shape index: {}]  }
   0x1   :  { %v1157_v0 = vld [vmem:[%s1686_s1 + $0xe4] ss:$16 sps:$4 sm:$0xff]   ;;  %v1159_v1 = vld [vmem:[%s1686_s1 + $0xec] ss:$16 sps:$4 sm:$0xff]   ;;  %v1161_v2 = vld [vmem:[%s1686_s1 + $0xe0] ss:$16 sps:$4 sm:$0xff]  }
   0x2   :  { %438 = vmatprep.subr.bf16.mxu0 %v1157_v0  ;;  %v1162_v3 = vld [vmem:[%s1686_s1 + $0xe8] ss:$16 sps:$4 sm:$0xff]   ;;  %479 = vmatprep.subr.bf16.mxu1 %v1159_v1  ;;  %v1163_v4 = vld [vmem:[%s1686_s1 + $0xc4] ss:$16 sps:$4 sm:$0xff]   ;;  %v1165_v5 = vld [vmem:[%s1686_s1 + $0xcc] ss:$16 sps:$4 sm:$0xff]  }
   0x3   :  { %439 = vmatpush1.bf16.msra.mxu0 %v1161_v2  ;;  %480 = vmatpush1.bf16.msra.mxu1 %v1162_v3  ;;  %v1167_v6 = vld [vmem:[%s1686_s1 + $0xc0] ss:$16 sps:$4 sm:$0xff]   ;;  %v1168_v7 = vld [vmem:[%s1686_s1 + $0xc8] ss:$16 sps:$4 sm:$0xff]   ;;  %v1169_v8 = vld [vmem:[%s1686_s1 + $0xa4] ss:$16 sps:$4 sm:$0xff]  }
   0x4   :  { %440 = vmatprep.subr.bf16.mxu0 %v1163_v4  ;;  %481 = vmatprep.subr.bf16.mxu1 %v1165_v5  ;;  %v1171_v9 = vld [vmem:[%s1686_s1 + $0xac] ss:$16 sps:$4 sm:$0xff]   ;;  %v1173_v10 = vld [vmem:[%s1686_s1 + $0xa0] ss:$16 sps:$4 sm:$0xff]   ;;  %v1174_v11 = vld [vmem:[%s1686_s1 + $0xa8] ss:$16 sps:$4 sm:$0xff]  }
   0x5   :  { %v1175_v12 = vld [vmem:[%s1686_s1 + $0x84] ss:$16 sps:$4 sm:$0xff]   ;;  %v1177_v13 = vld [vmem:[%s1686_s1 + $0x8c] ss:$16 sps:$4 sm:$0xff]   ;;  %v1179_v14 = vld [vmem:[%s1686_s1 + $0x80] ss:$16 sps:$4 sm:$0xff]  }
   0x6   :  { %v1180_v15 = vld [vmem:[%s1686_s1 + $0x88] ss:$16 sps:$4 sm:$0xff]   ;;  %v1181_v16 = vld [vmem:[%s1686_s1 + $0x64] ss:$16 sps:$4 sm:$0xff]   ;;  %v1183_v17 = vld [vmem:[%s1686_s1 + $0x6c] ss:$16 sps:$4 sm:$0xff]  }
   0x7   :  { %441 = vmatpush1.bf16.msra.mxu0 %v1167_v6  ;;  %482 = vmatpush1.bf16.msra.mxu1 %v1168_v7  ;;  %v1185_v18 = vld [vmem:[%s1686_s1 + $0x60] ss:$16 sps:$4 sm:$0xff]   ;;  %v1186_v19 = vld [vmem:[%s1686_s1 + $0x68] ss:$16 sps:$4 sm:$0xff]   ;;  %v1187_v20 = vld [vmem:[%s1686_s1 + $0x44] ss:$16 sps:$4 sm:$0xff]  }
   0x8   :  { %442 = vmatprep.subr.bf16.mxu0 %v1169_v8  ;;  %483 = vmatprep.subr.bf16.mxu1 %v1171_v9  ;;  %v1189_v21 = vld [vmem:[%s1686_s1 + $0x4c] ss:$16 sps:$4 sm:$0xff]   ;;  %v1191_v22 = vld [vmem:[%s1686_s1 + $0x40] ss:$16 sps:$4 sm:$0xff]   ;;  %v1192_v23 = vld [vmem:[%s1686_s1 + $0x48] ss:$16 sps:$4 sm:$0xff]  }
   0x9   :  { %v1193_v24 = vld [vmem:[%s1686_s1 + $0x24] ss:$16 sps:$4 sm:$0xff]   ;;  %v1195_v25 = vld [vmem:[%s1686_s1 + $0x2c] ss:$16 sps:$4 sm:$0xff]   ;;  %v1197_v26 = vld [vmem:[%s1686_s1 + $0x20] ss:$16 sps:$4 sm:$0xff]  }
   0xa   :  { %v1198_v27 = vld [vmem:[%s1686_s1 + $0x28] ss:$16 sps:$4 sm:$0xff]   ;;  %v1199_v28 = vld [vmem:[%s1686_s1 + $0x4] ss:$16 sps:$4 sm:$0xff]   ;;  %v1201_v29 = vld [vmem:[%s1686_s1 + $0xc] ss:$16 sps:$4 sm:$0xff]  }
   0xb   :  { %443 = vmatpush1.bf16.msra.mxu0 %v1173_v10  ;;  %484 = vmatpush1.bf16.msra.mxu1 %v1174_v11  ;;  %v1203_v30 = vld [vmem:[%s1686_s1] ss:$16 sps:$4 sm:$0xff]   ;;  %v1204_v31 = vld [vmem:[%s1686_s1 + $0x8] ss:$16 sps:$4 sm:$0xff]   ;;  %v1205_v32 = vld [vmem:[%s1686_s1 + $0x1e4] ss:$16 sps:$4 sm:$0xff]  }
   0xc   :  { %444 = vmatprep.subr.bf16.mxu0 %v1175_v12  ;;  %485 = vmatprep.subr.bf16.mxu1 %v1177_v13  ;;  %v1207_v33 = vld [vmem:[%s1686_s1 + $0x1ec] ss:$16 sps:$4 sm:$0xff]   ;;  %v1209_v34 = vld [vmem:[%s1686_s1 + $0x1e0] ss:$16 sps:$4 sm:$0xff]   ;;  %v1210_v35 = vld [vmem:[%s1686_s1 + $0x1e8] ss:$16 sps:$4 sm:$0xff]  }
   0xd   :  { %v1211_v36 = vld [vmem:[%s1686_s1 + $0x1c4] ss:$16 sps:$4 sm:$0xff]   ;;  %v1213_v37 = vld [vmem:[%s1686_s1 + $0x1cc] ss:$16 sps:$4 sm:$0xff]   ;;  %v1215_v38 = vld [vmem:[%s1686_s1 + $0x1c0] ss:$16 sps:$4 sm:$0xff]  }
   0xe   :  { %v1216_v39 = vld [vmem:[%s1686_s1 + $0x1c8] ss:$16 sps:$4 sm:$0xff]   ;;  %v1217_v40 = vld [vmem:[%s1686_s1 + $0x1a4] ss:$16 sps:$4 sm:$0xff]   ;;  %v1219_v41 = vld [vmem:[%s1686_s1 + $0x1ac] ss:$16 sps:$4 sm:$0xff]  }
   0xf   :  { %445 = vmatpush1.bf16.msra.mxu0 %v1179_v14  ;;  %486 = vmatpush1.bf16.msra.mxu1 %v1180_v15  ;;  %v1221_v42 = vld [vmem:[%s1686_s1 + $0x1a0] ss:$16 sps:$4 sm:$0xff]   ;;  %v1222_v43 = vld [vmem:[%s1686_s1 + $0x1a8] ss:$16 sps:$4 sm:$0xff]   ;;  %v1223_v44 = vld [vmem:[%s1686_s1 + $0x184] ss:$16 sps:$4 sm:$0xff]  }
  0x10   :  { %446 = vmatprep.subr.bf16.mxu0 %v1181_v16  ;;  %487 = vmatprep.subr.bf16.mxu1 %v1183_v17  ;;  %v1225_v45 = vld [vmem:[%s1686_s1 + $0x18c] ss:$16 sps:$4 sm:$0xff]   ;;  %v1227_v46 = vld [vmem:[%s1686_s1 + $0x180] ss:$16 sps:$4 sm:$0xff]   ;;  %v1228_v47 = vld [vmem:[%s1686_s1 + $0x188] ss:$16 sps:$4 sm:$0xff]  }
  0x11   :  { %v29_v48 = vld [vmem:[%s1685_s0 + $0x8] sm:$0xff]  ;;  %v1229_v49 = vld [vmem:[%s1686_s1 + $0x164] ss:$16 sps:$4 sm:$0xff]   ;;  %v1233_v52 = vld [vmem:[%s1686_s1 + $0x160] ss:$16 sps:$4 sm:$0xff]  }
  0x12   :  { %v1231_v50 = vld [vmem:[%s1686_s1 + $0x16c] ss:$16 sps:$4 sm:$0xff]   ;;  %v31_v51 = vpack.c.bf16 %v29_v48, %v29_v48  ;;  %v1234_v53 = vld [vmem:[%s1686_s1 + $0x168] ss:$16 sps:$4 sm:$0xff]   ;;  %v1235_v54 = vld [vmem:[%s1686_s1 + $0x144] ss:$16 sps:$4 sm:$0xff]  }
  0x13   :  { %447 = vmatpush1.bf16.msra.mxu0 %v1185_v18  ;;  %488 = vmatpush1.bf16.msra.mxu1 %v1186_v19  ;;  %v1237_v55 = vld [vmem:[%s1686_s1 + $0x14c] ss:$16 sps:$4 sm:$0xff]   ;;  %v1239_v56 = vld [vmem:[%s1686_s1 + $0x140] ss:$16 sps:$4 sm:$0xff]   ;;  %v1240_v57 = vld [vmem:[%s1686_s1 + $0x148] ss:$16 sps:$4 sm:$0xff]  }
  0x14   :  { %448 = vmatprep.subr.bf16.mxu0 %v1187_v20  ;;  %489 = vmatprep.subr.bf16.mxu1 %v1189_v21  ;;  %v1241_v58 = vld [vmem:[%s1686_s1 + $0x124] ss:$16 sps:$4 sm:$0xff]   ;;  %v1243_v59 = vld [vmem:[%s1686_s1 + $0x12c] ss:$16 sps:$4 sm:$0xff]   ;;  %v1245_v60 = vld [vmem:[%s1686_s1 + $0x120] ss:$16 sps:$4 sm:$0xff]  }
  0x15   :  { %470 = vmatprep.mubr.bf16.mxu0 %v31_v51  ;;  %511 = vmatprep.mubr.bf16.mxu1 %v31_v51  ;;  %v1246_v61 = vld [vmem:[%s1686_s1 + $0x128] ss:$16 sps:$4 sm:$0xff]   ;;  %v1247_v62 = vld [vmem:[%s1686_s1 + $0x104] ss:$16 sps:$4 sm:$0xff]   ;;  %v1249_v63 = vld [vmem:[%s1686_s1 + $0x10c] ss:$16 sps:$4 sm:$0xff]  }
  0x16   :  { %v1251_v0 = vld [vmem:[%s1686_s1 + $0x100] ss:$16 sps:$4 sm:$0xff]   ;;  %v1252_v1 = vld [vmem:[%s1686_s1 + $0x108] ss:$16 sps:$4 sm:$0xff]  }
  0x17   :  { %449 = vmatpush1.bf16.msra.mxu0 %v1191_v22  ;;  %490 = vmatpush1.bf16.msra.mxu1 %v1192_v23  ;;  %v28_v2 = vld [vmem:[%s1685_s0] sm:$0xff] }
  0x18   :  { %450 = vmatprep.subr.bf16.mxu0 %v1193_v24  ;;  %491 = vmatprep.subr.bf16.mxu1 %v1195_v25  ;;  %v30_v3 = vpack.c.bf16 %v28_v2, %v28_v2 }
  0x1b   :  { %451 = vmatpush1.bf16.msra.mxu0 %v1197_v26  ;;  %492 = vmatpush1.bf16.msra.mxu1 %v1198_v27 }
  0x1c   :  { %452 = vmatprep.subr.bf16.mxu0 %v1199_v28  ;;  %493 = vmatprep.subr.bf16.mxu1 %v1201_v29 }
  0x1f   :  { %453 = vmatpush1.bf16.msra.mxu0 %v1203_v30  ;;  %494 = vmatpush1.bf16.msra.mxu1 %v1204_v31 }
  0x20   :  { %454 = vmatprep.subr.bf16.mxu0 %v1205_v32  ;;  %495 = vmatprep.subr.bf16.mxu1 %v1207_v33 }
  0x23   :  { %455 = vmatpush2.bf16.msra.mxu0 %v1209_v34  ;;  %496 = vmatpush2.bf16.msra.mxu1 %v1210_v35 }
  0x24   :  { %456 = vmatprep.subr.bf16.mxu0 %v1211_v36  ;;  %497 = vmatprep.subr.bf16.mxu1 %v1213_v37 }
  0x27   :  { %457 = vmatpush2.bf16.msra.mxu0 %v1215_v38  ;;  %498 = vmatpush2.bf16.msra.mxu1 %v1216_v39 }
  0x28   :  { %458 = vmatprep.subr.bf16.mxu0 %v1217_v40  ;;  %499 = vmatprep.subr.bf16.mxu1 %v1219_v41 }
  0x2b   :  { %459 = vmatpush2.bf16.msra.mxu0 %v1221_v42  ;;  %500 = vmatpush2.bf16.msra.mxu1 %v1222_v43 }
  0x2c   :  { %460 = vmatprep.subr.bf16.mxu0 %v1223_v44  ;;  %501 = vmatprep.subr.bf16.mxu1 %v1225_v45 }
  0x2f   :  { %461 = vmatpush2.bf16.msra.mxu0 %v1227_v46  ;;  %502 = vmatpush2.bf16.msra.mxu1 %v1228_v47 }
  0x30   :  { %462 = vmatprep.subr.bf16.mxu0 %v1229_v49  ;;  %503 = vmatprep.subr.bf16.mxu1 %v1231_v50 }
  0x33   :  { %463 = vmatpush2.bf16.msra.mxu0 %v1233_v52  ;;  %504 = vmatpush2.bf16.msra.mxu1 %v1234_v53 }
  0x34   :  { %464 = vmatprep.subr.bf16.mxu0 %v1235_v54  ;;  %505 = vmatprep.subr.bf16.mxu1 %v1237_v55 }
  0x37   :  { %465 = vmatpush2.bf16.msra.mxu0 %v1239_v56  ;;  %506 = vmatpush2.bf16.msra.mxu1 %v1240_v57 }
  0x38   :  { %466 = vmatprep.subr.bf16.mxu0 %v1241_v58  ;;  %507 = vmatprep.subr.bf16.mxu1 %v1243_v59 }
  0x3b   :  { %467 = vmatpush2.bf16.msra.mxu0 %v1245_v60  ;;  %508 = vmatpush2.bf16.msra.mxu1 %v1246_v61 }
  0x3c   :  { %468 = vmatprep.subr.bf16.mxu0 %v1247_v62  ;;  %509 = vmatprep.subr.bf16.mxu1 %v1249_v63 }
  0x3f   :  { %469 = vmatpush2.bf16.msra.mxu0 %v1251_v0  ;;  %510 = vmatpush2.bf16.msra.mxu1 %v1252_v1 }
  0x40   :  { %12 = vsyncpa [#allocation3], 0  ;;  %v1253_v4 = vld [vmem:[%s1690_s5 + $0x78] sm:$0xff]   ;;  %v1257_v8 = vld [vmem:[%s1690_s5 + $0x70] sm:$0xff]   ;;  %v98_v36 = vlaneseq  ;;  %s1315_s11 = smov [#allocation2]  }
  0x41   :  { %v1254_v5 = vld [vmem:[%s1690_s5 + $0xf8] sm:$0xff]   ;;  %1112 = vmatprep.subr.bf16.mxu0 %v1253_v4  ;;  %v1258_v9 = vld [vmem:[%s1690_s5 + $0xf0] sm:$0xff]   ;;  %v1261_v12 = vld [vmem:[%s1690_s5 + $0x68] sm:$0xff]   ;;  %s1007_s12 = sshll.u32 %s1315_s11, 4  ;;  %s1008_s12 = int_to_ptr.vmem [resolvable:$true] %s1007_s12 }
  0x42   :  { %471 = vmatmul.mubr.bf16.vlgmr.msra.gmra.mxu0 %v30_v3  ;;  %512 = vmatmul.mubr.bf16.vlgmr.msra.gmra.mxu1 %v30_v3  ;;  %v1255_v6 = vld [vmem:[%s1690_s5 + $0x38] sm:$0xff]   ;;  %v1259_v10 = vld [vmem:[%s1690_s5 + $0x30] sm:$0xff]   ;;  %v1262_v13 = vld [vmem:[%s1690_s5 + $0xe8] sm:$0xff]   ;;  %v99_v37 = vshrl.u32 %v98_v36, 7  ;;  %s1293_s13 = scalar_lea.vmem %s1008_s12, 128  ;;  %p1298_p1 = scmp.lt.s32.totalorder %s1008_s12, %s1008_s12 }
  0x43   :  { %v1256_v7 = vld [vmem:[%s1690_s5 + $0xb8] sm:$0xff]   ;;  %1134 = vmatprep.subr.bf16.mxu1 %v1254_v5  ;;  %1113 = vmatpush3.bf16.msra.mxu0 %v1255_v6  ;;  %v1260_v11 = vld [vmem:[%s1690_s5 + $0xb0] sm:$0xff]   ;;  %v1263_v14 = vld [vmem:[%s1690_s5 + $0x28] sm:$0xff]   ;;  %p1294_p0 = scmp.ne.s32.totalorder %s1008_s12, %s1293_s13  ;;  %p1299_p2 = scmp.lt.s32.totalorder %s1293_s13, %s1293_s13 }
  0x44   :  { %1135 = vmatpush3.bf16.msra.mxu1 %v1256_v7  ;;  %1114 = vmatprep.subr.bf16.mxu0 %v1257_v8  ;;  %v1264_v15 = vld [vmem:[%s1690_s5 + $0xa8] sm:$0xff]   ;;  %v1265_v16 = vld [vmem:[%s1690_s5 + $0x60] sm:$0xff]   ;;  %v1269_v20 = vld [vmem:[%s1690_s5 + $0x58] sm:$0xff]   ;;  %v1650_v38 = vsub.s32 0, %v99_v37  ;;  %v1652_v39 = vsub.s32 2, %v99_v37  ;;  %v1657_v41 = vsub.s32 1, %v99_v37 }
  0x45   :  { %1136 = vmatprep.subr.bf16.mxu1 %v1258_v9  ;;  %v1266_v17 = vld [vmem:[%s1690_s5 + $0xe0] sm:$0xff]   ;;  %v1270_v21 = vld [vmem:[%s1690_s5 + $0xd8] sm:$0xff]   ;;  %v1273_v24 = vld [vmem:[%s1690_s5 + $0x50] sm:$0xff]   ;;  %v1659_v42 = vsub.s32 3, %v99_v37  ;;  %p1300_p3 = por %p1299_p2, %p1298_p1 }
  0x46   :  { %v1267_v18 = vld [vmem:[%s1690_s5 + $0x20] sm:$0xff]   ;;  %v1271_v22 = vld [vmem:[%s1690_s5 + $0x18] sm:$0xff]   ;;  %v1274_v25 = vld [vmem:[%s1690_s5 + $0xd0] sm:$0xff]  }
  0x47   :  { %1115 = vmatpush3.bf16.msra.mxu0 %v1259_v10  ;;  %v1268_v19 = vld [vmem:[%s1690_s5 + $0xa0] sm:$0xff]   ;;  %v1272_v23 = vld [vmem:[%s1690_s5 + $0x98] sm:$0xff]   ;;  %v1275_v26 = vld [vmem:[%s1690_s5 + $0x10] sm:$0xff]   ;;  %p1301_p4 = pnand %p1300_p3, %p1294_p0 }
  0x48   :  { %1137 = vmatpush3.bf16.msra.mxu1 %v1260_v11  ;;  %1116 = vmatprep.subr.bf16.mxu0 %v1261_v12  ;;  %v1276_v27 = vld [vmem:[%s1690_s5 + $0x90] sm:$0xff]   ;;  %v1277_v28 = vld [vmem:[%s1690_s5 + $0x48] sm:$0xff]   ;;  %v1281_v32 = vld [vmem:[%s1690_s5 + $0x40] sm:$0xff]  }
  0x49   :  { %1138 = vmatprep.subr.bf16.mxu1 %v1262_v13  ;;  %v1278_v29 = vld [vmem:[%s1690_s5 + $0xc8] sm:$0xff]   ;;  %v1282_v33 = vld [vmem:[%s1690_s5 + $0xc0] sm:$0xff]  }
  0x4a   :  { %v1279_v30 = vld [vmem:[%s1690_s5 + $0x8] sm:$0xff]   ;;  %v1283_v34 = vld [vmem:[%s1690_s5] sm:$0xff]  }
  0x4b   :  { %1117 = vmatpush3.bf16.msra.mxu0 %v1263_v14  ;;  %v1280_v31 = vld [vmem:[%s1690_s5 + $0x88] sm:$0xff]   ;;  %v1284_v35 = vld [vmem:[%s1690_s5 + $0x80] sm:$0xff]  }
  0x4c   :  { %1139 = vmatpush3.bf16.msra.mxu1 %v1264_v15  ;;  %1118 = vmatprep.subr.bf16.mxu0 %v1265_v16  ;;  %v96_v40 = vld [vmem:[%s1687_s2] sm:$0xf] }
  0x4d   :  { %1140 = vmatprep.subr.bf16.mxu1 %v1266_v17  ;;  %v101_v43 = vrot.slane %v96_v40, %v1650_v38  ;;  %v109_v44 = vrot.slane %v96_v40, %v1652_v39  ;;  %v105_v45 = vrot.slane %v96_v40, %v1657_v41  ;;  %v113_v46 = vrot.slane %v96_v40, %v1659_v42 }
  0x4f   :  { %1119 = vmatpush3.bf16.msra.mxu0 %v1267_v18 }
  0x50   :  { %1141 = vmatpush3.bf16.msra.mxu1 %v1268_v19  ;;  %1120 = vmatprep.subr.bf16.mxu0 %v1269_v20 }
  0x51   :  { %1142 = vmatprep.subr.bf16.mxu1 %v1270_v21 }
  0x53   :  { %1121 = vmatpush3.bf16.msra.mxu0 %v1271_v22 }
  0x54   :  { %1143 = vmatpush3.bf16.msra.mxu1 %v1272_v23  ;;  %1122 = vmatprep.subr.bf16.mxu0 %v1273_v24 }
  0x55   :  { %1144 = vmatprep.subr.bf16.mxu1 %v1274_v25 }
  0x57   :  { %1123 = vmatpush3.bf16.msra.mxu0 %v1275_v26 }
  0x58   :  { %1145 = vmatpush3.bf16.msra.mxu1 %v1276_v27  ;;  %1124 = vmatprep.subr.bf16.mxu0 %v1277_v28 }
  0x59   :  { %1146 = vmatprep.subr.bf16.mxu1 %v1278_v29 }
  0x5b   :  { %1125 = vmatpush3.bf16.msra.mxu0 %v1279_v30 }
  0x5c   :  { %1147 = vmatpush3.bf16.msra.mxu1 %v1280_v31  ;;  %1126 = vmatprep.subr.bf16.mxu0 %v1281_v32 }
  0x5d   :  { %1148 = vmatprep.subr.bf16.mxu1 %v1282_v33 }
  0x5f   :  { %1127 = vmatpush3.bf16.msra.mxu0 %v1283_v34 }
  0x60   :  { %1149 = vmatpush3.bf16.msra.mxu1 %v1284_v35 }
 0x102   :  { %v472_v47 = vpop.f32.mrf.mxu0  ;;  %v513_v48 = vpop.f32.mrf.mxu1 }
 0x103   :  { %v473_v49 = vadd.f32 %v472_v47, %v101_v43  ;;  %v514_v50 = vadd.f32 %v513_v48, %v109_v44 }
 0x104   :  { %v474_v51 = vpop.f32.mrf.mxu0  ;;  %v515_v52 = vpop.f32.mrf.mxu1 }
 0x105   :  { %v520_v53 = vrot.slane %v473_v49, 4  ;;  %v532_v54 = vrot.slane %v514_v50, 4  ;;  %v475_v55 = vadd.f32 %v474_v51, %v105_v45  ;;  %v516_v56 = vadd.f32 %v515_v52, %v113_v46 }
 0x106   :  { %v476_v57 = vpop.f32.mrf.mxu0  ;;  %v517_v58 = vpop.f32.mrf.mxu1 }
 0x107   :  { %v521_v59 = vadd.f32 %v520_v53, %v473_v49  ;;  %v533_v60 = vadd.f32 %v532_v54, %v514_v50  ;;  %v526_v61 = vrot.slane %v475_v55, 4  ;;  %v538_v62 = vrot.slane %v516_v56, 4 }
 0x108   :  { %v477_v63 = vpop.f32.mrf.mxu0  ;;  %v518_v0 = vpop.f32.mrf.mxu1 }
 0x109   :  { %v522_v1 = vrot.slane %v521_v59, 2  ;;  %v534_v2 = vrot.slane %v533_v60, 2  ;;  %v527_v3 = vadd.f32 %v526_v61, %v475_v55  ;;  %v539_v4 = vadd.f32 %v538_v62, %v516_v56 }
 0x10b   :  { %v523_v5 = vadd.f32 %v522_v1, %v521_v59  ;;  %v535_v6 = vadd.f32 %v534_v2, %v533_v60  ;;  %v528_v7 = vrot.slane %v527_v3, 2  ;;  %v540_v8 = vrot.slane %v539_v4, 2 }
 0x10d   :  { %v524_v9 = vrot.slane %v523_v5, 1  ;;  %v536_v10 = vrot.slane %v535_v6, 1  ;;  %v529_v11 = vadd.f32 %v528_v7, %v527_v3  ;;  %v541_v12 = vadd.f32 %v540_v8, %v539_v4  ;;  %v597_v3 = vld [vmem:[%s1688_s3] sm:$0xf] }
 0x10e   :  { %v623_v4 = vld [vmem:[%s1689_s4] sm:$0xf]  ;;  %v610_v7 = vrot.slane %v597_v3, %v1652_v39 }
 0x10f   :  { %v525_v13 = vadd.f32 %v524_v9, %v523_v5  ;;  %v537_v14 = vadd.f32 %v536_v10, %v535_v6  ;;  %v530_v15 = vrot.slane %v529_v11, 1  ;;  %v542_v16 = vrot.slane %v541_v12, 1 }
 0x110   :  { %v602_v5 = vrot.slane %v597_v3, %v1650_v38  ;;  %v606_v10 = vrot.slane %v597_v3, %v1657_v41 }
 0x111   :  { %v545_v17 = vmul.f32 0.125, %v525_v13  ;;  %v547_v18 = vmul.f32 0.125, %v537_v14  ;;  %v531_v19 = vadd.f32 %v530_v15, %v529_v11  ;;  %v543_v20 = vadd.f32 %v542_v16, %v541_v12 }
 0x112   :  { %v628_v11 = vrot.slane %v623_v4, %v1650_v38  ;;  %v614_v14 = vrot.slane %v597_v3, %v1659_v42  ;;  %v636_v15 = vrot.slane %v623_v4, %v1652_v39 }
 0x113   :  { %v549_v21 = vsub.f32 %v473_v49, %v545_v17  ;;  %v551_v22 = vsub.f32 %v514_v50, %v547_v18  ;;  %v546_v23 = vmul.f32 0.125, %v531_v19  ;;  %v548_v24 = vmul.f32 0.125, %v543_v20 }
 0x114   :  { %v632_v19 = vrot.slane %v623_v4, %v1657_v41 }
 0x115   :  { %v553_v25 = vmul.f32 %v549_v21, %v549_v21  ;;  %v555_v26 = vmul.f32 %v551_v22, %v551_v22  ;;  %v550_v27 = vsub.f32 %v475_v55, %v546_v23  ;;  %v552_v28 = vsub.f32 %v516_v56, %v548_v24 }
 0x116   :  { %v640_v24 = vrot.slane %v623_v4, %v1659_v42 }
 0x117   :  { %v557_v29 = vrot.slane %v553_v25, 4  ;;  %v569_v30 = vrot.slane %v555_v26, 4  ;;  %v554_v31 = vmul.f32 %v550_v27, %v550_v27  ;;  %v556_v32 = vmul.f32 %v552_v28, %v552_v28 }
 0x119   :  { %v558_v33 = vadd.f32 %v557_v29, %v553_v25  ;;  %v570_v34 = vadd.f32 %v569_v30, %v555_v26  ;;  %v563_v35 = vrot.slane %v554_v31, 4  ;;  %v575_v36 = vrot.slane %v556_v32, 4 }
 0x11b   :  { %v559_v37 = vrot.slane %v558_v33, 2  ;;  %v571_v40 = vrot.slane %v570_v34, 2  ;;  %v564_v43 = vadd.f32 %v563_v35, %v554_v31  ;;  %v576_v44 = vadd.f32 %v575_v36, %v556_v32 }
 0x11d   :  { %v560_v45 = vadd.f32 %v559_v37, %v558_v33  ;;  %v572_v46 = vadd.f32 %v571_v40, %v570_v34  ;;  %v565_v47 = vrot.slane %v564_v43, 2  ;;  %v577_v48 = vrot.slane %v576_v44, 2 }
 0x11f   :  { %v561_v49 = vrot.slane %v560_v45, 1  ;;  %v573_v50 = vrot.slane %v572_v46, 1  ;;  %v566_v51 = vadd.f32 %v565_v47, %v564_v43  ;;  %v578_v52 = vadd.f32 %v577_v48, %v576_v44 }
 0x121   :  { %v562_v53 = vadd.f32 %v561_v49, %v560_v45  ;;  %v574_v54 = vadd.f32 %v573_v50, %v572_v46  ;;  %v567_v55 = vrot.slane %v566_v51, 1  ;;  %v579_v56 = vrot.slane %v578_v52, 1 }
 0x123   :  { %v581_v57 = vmul.f32 0.125, %v562_v53  ;;  %v583_v58 = vmul.f32 0.125, %v574_v54  ;;  %v568_v59 = vadd.f32 %v567_v55, %v566_v51  ;;  %v580_v60 = vadd.f32 %v579_v56, %v578_v52 }
 0x125   :  { %v585_v61 = vadd.f32 1e-05, %v581_v57  ;;  %v587_v62 = vadd.f32 1e-05, %v583_v58  ;;  %v582_v63 = vmul.f32 0.125, %v568_v59  ;;  %v584_v0 = vmul.f32 0.125, %v580_v60 }
 0x127   :  { %1285 = vrsqrt.f32 %v585_v61  ;;  %v586_v1 = vadd.f32 1e-05, %v582_v63  ;;  %v588_v2 = vadd.f32 1e-05, %v584_v0 }
 0x128   :  { %1287 = vrsqrt.f32 %v587_v62 }
 0x129   :  { %1289 = vrsqrt.f32 %v586_v1 }
 0x12a   :  { %1291 = vrsqrt.f32 %v588_v2 }
 0x134   :  { %v1286_v6 = vpop.eup %1285 }
 0x135   :  { %v1288_v8 = vpop.eup %1287  ;;  %v593_v9 = vmul.f32 %v1286_v6, %v549_v21 }
 0x136   :  { %v1290_v12 = vpop.eup %1289  ;;  %v595_v13 = vmul.f32 %v1288_v8, %v551_v22 }
 0x137   :  { %v1292_v16 = vpop.eup %1291  ;;  %v619_v17 = vmul.f32 %v602_v5, %v593_v9  ;;  %v594_v18 = vmul.f32 %v1290_v12, %v550_v27 }
 0x138   :  { %v621_v20 = vmul.f32 %v610_v7, %v595_v13  ;;  %v596_v23 = vmul.f32 %v1292_v16, %v552_v28  ;;  %v1079_v28 = vld [vmem:[%s1691_s6] ss:$0 sm:$0xff] }
 0x139   :  { %v620_v21 = vmul.f32 %v606_v10, %v594_v18  ;;  %v645_v25 = vadd.f32 %v628_v11, %v619_v17 }
 0x13a   :  { %v622_v26 = vmul.f32 %v614_v14, %v596_v23  ;;  %v647_v29 = vadd.f32 %v636_v15, %v621_v20 }
 0x13b   :  { %v646_v38 = vadd.f32 %v632_v19, %v620_v21  ;;  %v649_v22 = vmax.f32 %v645_v25, 0.0 }
 0x13c   :  { %v648_v30 = vadd.f32 %v640_v24, %v622_v26  ;;  %v651_v32 = vmax.f32 %v647_v29, 0.0 }
 0x13d   :  { %v650_v31 = vmax.f32 %v646_v38, 0.0  ;;  %v653_v35 = vpack.c.bf16 %v649_v22, %v649_v22 }
 0x13e   :  { %v652_v33 = vmax.f32 %v648_v30, 0.0  ;;  %v655_v27 = vpack.c.bf16 %v651_v32, %v651_v32 }
 0x13f   :  { %v654_v39 = vpack.c.bf16 %v650_v31, %v650_v31 }
 0x140   :  { %v656_v34 = vpack.c.bf16 %v652_v33, %v652_v33 }
 0x141   :  { %952 = vmatprep.mubr.bf16.mxu0 %v654_v39 }
 0x142   :  { %992 = vmatprep.mubr.bf16.mxu1 %v656_v34  ;;  %953 = vmatmul.mubr.bf16.vlgmr.msra.gmra.mxu0 %v653_v35 }
 0x143   :  { %993 = vmatmul.mubr.bf16.vlgmr.msra.gmra.mxu1 %v655_v27 }
 0x202   :  { %v1128_v41 = vpop.f32.mrf.mxu0 }
 0x203   :  { %v1150_v42 = vpop.f32.mrf.mxu1 }
 0x204   :  { %v1129_v36 = vpop.f32.mrf.mxu0 }
 0x205   :  { %v1130_v37 = vadd.f32 %v1129_v36, %v1128_v41  ;;  %v1151_v40 = vpop.f32.mrf.mxu1 }
 0x206   :  { %v1131_v43 = vpop.f32.mrf.mxu0  ;;  %v1152_v45 = vadd.f32 %v1151_v40, %v1150_v42 }
 0x207   :  { %v955_v44 = vadd.f32 %v1130_v37, %v1079_v28  ;;  %v1153_v46 = vpop.f32.mrf.mxu1 }
 0x208   :  { %v1132_v47 = vpop.f32.mrf.mxu0 }
 0x209   :  { %v1154_v48 = vpop.f32.mrf.mxu1  ;;  %v995_v49 = vadd.f32 %v1152_v45, %v955_v44 }
 0x20b   :  { %1000 = vst [vmem:[#allocation2] sm:$0xff] %v995_v49 }
 0x20c   :  { %1304 = shalt.err (!%p1301_p4)
}
 0x20d   :  { %1010 = dma.vmem_to_hbm [thread:$0]  %s1008_s12, 128, %s1692_s7, [#allocation3]  }
 0x20e   :  { %1313 = dma.done.wait [#allocation3], 128  }
 0x20f   :  { %1314 = vsyncadd [#allocation3], 4294967168 }
 0x210   :  { %1014 = vsyncpa [#allocation3], 1 }

// kernel: dcl_forward.2
= control target key start
LH: loop header
LB: loop body
LE: loop exit
PB: predicated region body
PF: predicated region fallthrough
CT: control target
= control target key end

     0   :  { %s2346_s12 = smov 0   ;;  %s3007_s0 = inlined_call_operand.vmem [shape: bf16[2048,128], index: 0, kind: input, shape index: {}]   ;;  %s3008_s1 = inlined_call_operand.vmem [shape: bf16[128,256], index: 1, kind: input, shape index: {}]   ;;  %s3009_s2 = inlined_call_operand.vmem [shape: f32[1,256], index: 2, kind: input, shape index: {}]   ;;  %s3010_s3 = inlined_call_operand.vmem [shape: f32[2,4,256], index: 3, kind: output, shape index: {}]  }
   0x1 LB: > { %s2352_s13 = sadd.s32 4294967295, %s2323_s12   ;;  %p2116_p0 = scmp.ge.s32.totalorder %s2323_s12, 1  ;;  %s2323_s12 = sphi %s2346_s12, %s13_s12  }
   0x2   : > { %p138_p1 = scmp.lt.s32.totalorder %s2323_s12, 3 }
   0x4   : > { %p139_p2 = pnand %p2116_p0, %p138_p1 }
   0x5   : > { %s2117_s16 = sshll.u32 (!%p139_p2), %s2352_s13, 7  ;;  %p168_p4 = scmp.lt.s32.totalorder (!%p139_p2), %s2352_s13, 1 }
   0x6   : > { %142 = sbr.rel (%p139_p2) target bundleno = 523 (0x20b), region = 32  ;;  %p163_p3 = scmp.lt.s32.totalorder (!%p139_p2), %s2117_s16, 255 }
   0xb   : > { %v2229_v0 = vld [vmem:[%s3008_s1 + $0x74] ss:$8 sps:$4 sm:$0xff]   ;;  %v2231_v1 = vld [vmem:[%s3008_s1 + $0x70] ss:$8 sps:$4 sm:$0xff]   ;;  %v2325_v2 = vmov 0   ;;  %s3012_s16 = smov (!%p163_p3, %s2117_s16), 255  ;;  %v320_v63 = vlaneseq }
   0xc   : > { %826 = vmatprep.mubr.bf16.mxu0 %v2325_v2  ;;  %1146 = vmatprep.mubr.bf16.mxu1 %v2325_v2  ;;  %v2232_v3 = vld [vmem:[%s3008_s1 + $0x64] ss:$8 sps:$4 sm:$0xff]   ;;  %v2234_v4 = vld [vmem:[%s3008_s1 + $0x60] ss:$8 sps:$4 sm:$0xff]   ;;  %v2235_v5 = vld [vmem:[%s3008_s1 + $0x54] ss:$8 sps:$4 sm:$0xff]  }
   0xd   : > { %794 = vmatprep.subr.bf16.mxu0 %v2229_v0  ;;  %2204 = vmatprep.subr.bf16.mxu1 %v2229_v0  ;;  %s2118_s25 = sshll.u32 %s3012_s16, 2  ;;  %v2237_v6 = vld [vmem:[%s3008_s1 + $0x50] ss:$8 sps:$4 sm:$0xff]   ;;  %v2238_v7 = vld [vmem:[%s3008_s1 + $0x44] ss:$8 sps:$4 sm:$0xff]   ;;  %s3014_s13 = smov (!%p168_p4, %s2352_s13), 1 }
   0xe   : > { %795 = vmatpush1.bf16.msra.mxu0 %v2231_v1  ;;  %2212 = vmatpush1.bf16.msra.mxu1 %v2231_v1  ;;  %s2383_s5 = scalar_lea.vmem %s3007_s0, %s2118_s25  ;;  %v2240_v8 = vld [vmem:[%s3008_s1 + $0x40] ss:$8 sps:$4 sm:$0xff]   ;;  %v2241_v9 = vld [vmem:[%s3008_s1 + $0x34] ss:$8 sps:$4 sm:$0xff]   ;;  %v2243_v10 = vld [vmem:[%s3008_s1 + $0x30] ss:$8 sps:$4 sm:$0xff]  }
   0xf   : > { %796 = vmatprep.subr.bf16.mxu0 %v2232_v3  ;;  %2205 = vmatprep.subr.bf16.mxu1 %v2232_v3  ;;  %v2244_v11 = vld [vmem:[%s3008_s1 + $0x24] ss:$8 sps:$4 sm:$0xff]   ;;  %v2246_v12 = vld [vmem:[%s3008_s1 + $0x20] ss:$8 sps:$4 sm:$0xff]   ;;  %v2247_v13 = vld [vmem:[%s3008_s1 + $0x14] ss:$8 sps:$4 sm:$0xff]  }
  0x10   : > { %v2249_v14 = vld [vmem:[%s3008_s1 + $0x10] ss:$8 sps:$4 sm:$0xff]   ;;  %v2250_v15 = vld [vmem:[%s3008_s1 + $0x4] ss:$8 sps:$4 sm:$0xff]   ;;  %v2252_v16 = vld [vmem:[%s3008_s1] ss:$8 sps:$4 sm:$0xff]  }
  0x11   : > { %v2253_v17 = vld [vmem:[%s2383_s5] sm:$0xff]   ;;  %v2255_v19 = vld [vmem:[%s2383_s5 + $0x8] sm:$0xff]   ;;  %v2257_v21 = vld [vmem:[%s2383_s5 + $0x10] sm:$0xff]   ;;  %v321_v3 = vshrl.u32 %v320_v63, 7  ;;  %vm2041_vm0 = vcmask 1041409   ;;  %vm2043_vm1 = vcmask 1045509  }
  0x12   : > { %797 = vmatpush1.bf16.msra.mxu0 %v2234_v4  ;;  %2213 = vmatpush1.bf16.msra.mxu1 %v2234_v4  ;;  %v2254_v18 = vld [vmem:[%s2383_s5 + $0x100] sm:$0xff]   ;;  %v2256_v20 = vld [vmem:[%s2383_s5 + $0x108] sm:$0xff]   ;;  %v2258_v22 = vld [vmem:[%s2383_s5 + $0x110] sm:$0xff]   ;;  %vm2046_vm2 = vcmask 1042434   ;;  %s2203_s28 = sshll.u32 %s3014_s13, 3  ;;  %vm2048_vm3 = vcmask 1046534  }
  0x13   : > { %798 = vmatprep.subr.bf16.mxu0 %v2235_v5  ;;  %2206 = vmatprep.subr.bf16.mxu1 %v2235_v5  ;;  %v2259_v23 = vld [vmem:[%s2383_s5 + $0x18] sm:$0xff]   ;;  %v2261_v25 = vld [vmem:[%s2383_s5 + $0x20] sm:$0xff]   ;;  %v2263_v27 = vld [vmem:[%s2383_s5 + $0x28] sm:$0xff]   ;;  %v322_v4 = vsub.s32 0, %v321_v3  ;;  %vm2051_vm4 = vcmask 1043459   ;;  %vm2053_vm5 = vcmask 1047559   ;;  %s172_s4 = scalar_lea.vmem %s3010_s3, %s2203_s28 }
  0x14   : > { %v2260_v24 = vld [vmem:[%s2383_s5 + $0x118] sm:$0xff]   ;;  %v2262_v26 = vld [vmem:[%s2383_s5 + $0x120] sm:$0xff]   ;;  %v2264_v28 = vld [vmem:[%s2383_s5 + $0x128] sm:$0xff]  }
  0x15   : > { %v2265_v29 = vld [vmem:[%s2383_s5 + $0x30] sm:$0xff]   ;;  %v2267_v31 = vld [vmem:[%s2383_s5 + $0x38] sm:$0xff]   ;;  %v2269_v33 = vld [vmem:[%s2383_s5 + $0x40] sm:$0xff]  }
  0x16   : > { %799 = vmatpush1.bf16.msra.mxu0 %v2237_v6  ;;  %2214 = vmatpush1.bf16.msra.mxu1 %v2237_v6  ;;  %v2266_v30 = vld [vmem:[%s2383_s5 + $0x130] sm:$0xff]   ;;  %v2268_v32 = vld [vmem:[%s2383_s5 + $0x138] sm:$0xff]   ;;  %v2270_v34 = vld [vmem:[%s2383_s5 + $0x140] sm:$0xff]  }
  0x17   : > { %800 = vmatprep.subr.bf16.mxu0 %v2238_v7  ;;  %2207 = vmatprep.subr.bf16.mxu1 %v2238_v7  ;;  %v2271_v35 = vld [vmem:[%s2383_s5 + $0x48] sm:$0xff]   ;;  %v2273_v37 = vld [vmem:[%s2383_s5 + $0x50] sm:$0xff]   ;;  %v2275_v39 = vld [vmem:[%s2383_s5 + $0x58] sm:$0xff]  }
  0x18   : > { %v2272_v36 = vld [vmem:[%s2383_s5 + $0x148] sm:$0xff]   ;;  %v2274_v38 = vld [vmem:[%s2383_s5 + $0x150] sm:$0xff]   ;;  %v2276_v40 = vld [vmem:[%s2383_s5 + $0x158] sm:$0xff]  }
  0x19   : > { %v2277_v41 = vld [vmem:[%s2383_s5 + $0x60] sm:$0xff]   ;;  %v2279_v43 = vld [vmem:[%s2383_s5 + $0x68] sm:$0xff]   ;;  %v2281_v45 = vld [vmem:[%s2383_s5 + $0x70] sm:$0xff]  }
  0x1a   : > { %801 = vmatpush1.bf16.msra.mxu0 %v2240_v8  ;;  %2215 = vmatpush1.bf16.msra.mxu1 %v2240_v8  ;;  %v2278_v42 = vld [vmem:[%s2383_s5 + $0x160] sm:$0xff]   ;;  %v2280_v44 = vld [vmem:[%s2383_s5 + $0x168] sm:$0xff]   ;;  %v2282_v46 = vld [vmem:[%s2383_s5 + $0x170] sm:$0xff]   ;;  %v326_v8 = vsub.s32 1, %v321_v3 }
  0x1b   : > { %802 = vmatprep.subr.bf16.mxu0 %v2241_v9  ;;  %2208 = vmatprep.subr.bf16.mxu1 %v2241_v9  ;;  %v2283_v47 = vld [vmem:[%s2383_s5 + $0x78] sm:$0xff]   ;;  %v2285_v49 = vld [vmem:[%s2383_s5 + $0x80] sm:$0xff]   ;;  %v2287_v51 = vld [vmem:[%s2383_s5 + $0x88] sm:$0xff]  }
  0x1c   : > { %v2284_v48 = vld [vmem:[%s2383_s5 + $0x178] sm:$0xff]   ;;  %v2286_v50 = vld [vmem:[%s2383_s5 + $0x180] sm:$0xff]   ;;  %v2288_v52 = vld [vmem:[%s2383_s5 + $0x188] sm:$0xff]  }
  0x1d   : > { %v2289_v53 = vld [vmem:[%s2383_s5 + $0x90] sm:$0xff]   ;;  %v2291_v55 = vld [vmem:[%s2383_s5 + $0x98] sm:$0xff]   ;;  %v2293_v57 = vld [vmem:[%s2383_s5 + $0xa0] sm:$0xff]  }
  0x1e   : > { %803 = vmatpush1.bf16.msra.mxu0 %v2243_v10  ;;  %2216 = vmatpush1.bf16.msra.mxu1 %v2243_v10  ;;  %v2290_v54 = vld [vmem:[%s2383_s5 + $0x190] sm:$0xff]   ;;  %v2292_v56 = vld [vmem:[%s2383_s5 + $0x198] sm:$0xff]   ;;  %v2294_v58 = vld [vmem:[%s2383_s5 + $0x1a0] sm:$0xff]  }
  0x1f   : > { %804 = vmatprep.subr.bf16.mxu0 %v2244_v11  ;;  %2209 = vmatprep.subr.bf16.mxu1 %v2244_v11  ;;  %v2295_v59 = vld [vmem:[%s2383_s5 + $0xa8] sm:$0xff]   ;;  %v2297_v61 = vld [vmem:[%s2383_s5 + $0xb0] sm:$0xff]   ;;  %v2299_v0 = vld [vmem:[%s2383_s5 + $0xb8] sm:$0xff]  }
  0x20   : > { %v2296_v60 = vld [vmem:[%s2383_s5 + $0x1a8] sm:$0xff]   ;;  %v2298_v62 = vld [vmem:[%s2383_s5 + $0x1b0] sm:$0xff]   ;;  %v2300_v1 = vld [vmem:[%s2383_s5 + $0x1b8] sm:$0xff]  }
  0x21   : > { %v318_v5 = vld [vmem:[%s3009_s2] sm:$0x3] }
  0x22   : > { %805 = vmatpush1.bf16.msra.mxu0 %v2246_v12  ;;  %2217 = vmatpush1.bf16.msra.mxu1 %v2246_v12  ;;  %v2301_v6 = vld [vmem:[%s2383_s5 + $0xc0] sm:$0xff]   ;;  %v2513_v9 = vrot.slane %v318_v5, %v322_v4  ;;  %v2515_v12 = vrot.slane %v318_v5, %v326_v8 }
  0x23   : > { %806 = vmatprep.subr.bf16.mxu0 %v2247_v13  ;;  %2210 = vmatprep.subr.bf16.mxu1 %v2247_v13  ;;  %v2302_v7 = vld [vmem:[%s2383_s5 + $0x1c0] sm:$0xff]  }
  0x26   : > { %807 = vmatpush1.bf16.msra.mxu0 %v2249_v14  ;;  %2218 = vmatpush1.bf16.msra.mxu1 %v2249_v14 }
  0x27   : > { %808 = vmatprep.subr.bf16.mxu0 %v2250_v15  ;;  %2211 = vmatprep.subr.bf16.mxu1 %v2250_v15 }
  0x2a   : > { %809 = vmatpush1.bf16.msra.mxu0 %v2252_v16  ;;  %2219 = vmatpush1.bf16.msra.mxu1 %v2252_v16 }
  0x2d   : > { %827 = vmatmul.mubr.bf16.vlgmr.msra.gmra.mxu0 %v2253_v17  ;;  %1147 = vmatmul.mubr.bf16.vlgmr.msra.gmra.mxu1 %v2254_v18 }
  0x2e   : > { %836 = vmatprep.mubr.bf16.mxu0 %v2325_v2  ;;  %1156 = vmatprep.mubr.bf16.mxu1 %v2325_v2 }
  0x35   : > { %837 = vmatmul.mubr.bf16.gmra.mxu0 %v2255_v19  ;;  %1157 = vmatmul.mubr.bf16.gmra.mxu1 %v2256_v20 }
  0x36   : > { %846 = vmatprep.mubr.bf16.mxu0 %v2325_v2  ;;  %1166 = vmatprep.mubr.bf16.mxu1 %v2325_v2 }
  0x3d   : > { %847 = vmatmul.mubr.bf16.gmra.mxu0 %v2257_v21  ;;  %1167 = vmatmul.mubr.bf16.gmra.mxu1 %v2258_v22  ;;  %v2303_v21 = vld [vmem:[%s2383_s5 + $0xc8] sm:$0xff]  }
  0x3e   : > { %856 = vmatprep.mubr.bf16.mxu0 %v2325_v2  ;;  %1176 = vmatprep.mubr.bf16.mxu1 %v2325_v2  ;;  %v2304_v22 = vld [vmem:[%s2383_s5 + $0x1c8] sm:$0xff]  }
  0x45   : > { %857 = vmatmul.mubr.bf16.gmra.mxu0 %v2259_v23  ;;  %1177 = vmatmul.mubr.bf16.gmra.mxu1 %v2260_v24 }
  0x46   : > { %866 = vmatprep.mubr.bf16.mxu0 %v2325_v2  ;;  %1186 = vmatprep.mubr.bf16.mxu1 %v2325_v2 }
  0x4d   : > { %867 = vmatmul.mubr.bf16.gmra.mxu0 %v2261_v25  ;;  %1187 = vmatmul.mubr.bf16.gmra.mxu1 %v2262_v26 }
  0x4e   : > { %876 = vmatprep.mubr.bf16.mxu0 %v2325_v2  ;;  %1196 = vmatprep.mubr.bf16.mxu1 %v2325_v2 }
  0x55   : > { %877 = vmatmul.mubr.bf16.gmra.mxu0 %v2263_v27  ;;  %1197 = vmatmul.mubr.bf16.gmra.mxu1 %v2264_v28 }
  0x56   : > { %886 = vmatprep.mubr.bf16.mxu0 %v2325_v2  ;;  %1206 = vmatprep.mubr.bf16.mxu1 %v2325_v2 }
  0x5d   : > { %887 = vmatmul.mubr.bf16.gmra.mxu0 %v2265_v29  ;;  %1207 = vmatmul.mubr.bf16.gmra.mxu1 %v2266_v30 }
  0x5e   : > { %896 = vmatprep.mubr.bf16.mxu0 %v2325_v2  ;;  %1216 = vmatprep.mubr.bf16.mxu1 %v2325_v2 }
  0x65   : > { %897 = vmatmul.mubr.bf16.gmra.mxu0 %v2267_v31  ;;  %1217 = vmatmul.mubr.bf16.gmra.mxu1 %v2268_v32 }
  0x66   : > { %906 = vmatprep.mubr.bf16.mxu0 %v2325_v2  ;;  %1226 = vmatprep.mubr.bf16.mxu1 %v2325_v2 }
  0x6d   : > { %907 = vmatmul.mubr.bf16.gmra.mxu0 %v2269_v33  ;;  %1227 = vmatmul.mubr.bf16.gmra.mxu1 %v2270_v34 }
  0x6e   : > { %916 = vmatprep.mubr.bf16.mxu0 %v2325_v2  ;;  %1236 = vmatprep.mubr.bf16.mxu1 %v2325_v2 }
  0x75   : > { %917 = vmatmul.mubr.bf16.gmra.mxu0 %v2271_v35  ;;  %1237 = vmatmul.mubr.bf16.gmra.mxu1 %v2272_v36 }
  0x76   : > { %926 = vmatprep.mubr.bf16.mxu0 %v2325_v2  ;;  %1246 = vmatprep.mubr.bf16.mxu1 %v2325_v2 }
  0x7d   : > { %927 = vmatmul.mubr.bf16.gmra.mxu0 %v2273_v37  ;;  %1247 = vmatmul.mubr.bf16.gmra.mxu1 %v2274_v38 }
  0x7e   : > { %936 = vmatprep.mubr.bf16.mxu0 %v2325_v2  ;;  %1256 = vmatprep.mubr.bf16.mxu1 %v2325_v2 }
  0x85   : > { %937 = vmatmul.mubr.bf16.gmra.mxu0 %v2275_v39  ;;  %1257 = vmatmul.mubr.bf16.gmra.mxu1 %v2276_v40 }
  0x86   : > { %946 = vmatprep.mubr.bf16.mxu0 %v2325_v2  ;;  %1266 = vmatprep.mubr.bf16.mxu1 %v2325_v2 }
  0x8d   : > { %947 = vmatmul.mubr.bf16.gmra.mxu0 %v2277_v41  ;;  %1267 = vmatmul.mubr.bf16.gmra.mxu1 %v2278_v42 }
  0x8e   : > { %956 = vmatprep.mubr.bf16.mxu0 %v2325_v2  ;;  %1276 = vmatprep.mubr.bf16.mxu1 %v2325_v2 }
  0x95   : > { %957 = vmatmul.mubr.bf16.gmra.mxu0 %v2279_v43  ;;  %1277 = vmatmul.mubr.bf16.gmra.mxu1 %v2280_v44 }
  0x96   : > { %966 = vmatprep.mubr.bf16.mxu0 %v2325_v2  ;;  %1286 = vmatprep.mubr.bf16.mxu1 %v2325_v2 }
  0x9d   : > { %967 = vmatmul.mubr.bf16.gmra.mxu0 %v2281_v45  ;;  %1287 = vmatmul.mubr.bf16.gmra.mxu1 %v2282_v46 }
  0x9e   : > { %976 = vmatprep.mubr.bf16.mxu0 %v2325_v2  ;;  %1296 = vmatprep.mubr.bf16.mxu1 %v2325_v2 }
  0xa5   : > { %977 = vmatmul.mubr.bf16.gmra.mxu0 %v2283_v47  ;;  %1297 = vmatmul.mubr.bf16.gmra.mxu1 %v2284_v48 }
  0xa6   : > { %986 = vmatprep.mubr.bf16.mxu0 %v2325_v2  ;;  %1306 = vmatprep.mubr.bf16.mxu1 %v2325_v2 }
  0xad   : > { %987 = vmatmul.mubr.bf16.gmra.mxu0 %v2285_v49  ;;  %1307 = vmatmul.mubr.bf16.gmra.mxu1 %v2286_v50 }
  0xae   : > { %996 = vmatprep.mubr.bf16.mxu0 %v2325_v2  ;;  %1316 = vmatprep.mubr.bf16.mxu1 %v2325_v2 }
  0xb5   : > { %997 = vmatmul.mubr.bf16.gmra.mxu0 %v2287_v51  ;;  %1317 = vmatmul.mubr.bf16.gmra.mxu1 %v2288_v52 }
  0xb6   : > { %1006 = vmatprep.mubr.bf16.mxu0 %v2325_v2  ;;  %1326 = vmatprep.mubr.bf16.mxu1 %v2325_v2 }
  0xbd   : > { %1007 = vmatmul.mubr.bf16.gmra.mxu0 %v2289_v53  ;;  %1327 = vmatmul.mubr.bf16.gmra.mxu1 %v2290_v54  ;;  %v2305_v53 = vld [vmem:[%s2383_s5 + $0xd0] sm:$0xff]  }
  0xbe   : > { %1016 = vmatprep.mubr.bf16.mxu0 %v2325_v2  ;;  %1336 = vmatprep.mubr.bf16.mxu1 %v2325_v2  ;;  %v2306_v54 = vld [vmem:[%s2383_s5 + $0x1d0] sm:$0xff]  }
  0xc5   : > { %1017 = vmatmul.mubr.bf16.gmra.mxu0 %v2291_v55  ;;  %1337 = vmatmul.mubr.bf16.gmra.mxu1 %v2292_v56 }
  0xc6   : > { %1026 = vmatprep.mubr.bf16.mxu0 %v2325_v2  ;;  %1346 = vmatprep.mubr.bf16.mxu1 %v2325_v2 }
  0xcd   : > { %1027 = vmatmul.mubr.bf16.gmra.mxu0 %v2293_v57  ;;  %1347 = vmatmul.mubr.bf16.gmra.mxu1 %v2294_v58 }
  0xce   : > { %1036 = vmatprep.mubr.bf16.mxu0 %v2325_v2  ;;  %1356 = vmatprep.mubr.bf16.mxu1 %v2325_v2 }
  0xd5   : > { %1037 = vmatmul.mubr.bf16.gmra.mxu0 %v2295_v59  ;;  %1357 = vmatmul.mubr.bf16.gmra.mxu1 %v2296_v60 }
  0xd6   : > { %1046 = vmatprep.mubr.bf16.mxu0 %v2325_v2  ;;  %1366 = vmatprep.mubr.bf16.mxu1 %v2325_v2 }
  0xdd   : > { %1047 = vmatmul.mubr.bf16.gmra.mxu0 %v2297_v61  ;;  %1367 = vmatmul.mubr.bf16.gmra.mxu1 %v2298_v62 }
  0xde   : > { %1056 = vmatprep.mubr.bf16.mxu0 %v2325_v2  ;;  %1376 = vmatprep.mubr.bf16.mxu1 %v2325_v2 }
  0xe5   : > { %1057 = vmatmul.mubr.bf16.gmra.mxu0 %v2299_v0  ;;  %1377 = vmatmul.mubr.bf16.gmra.mxu1 %v2300_v1 }
  0xe6   : > { %1066 = vmatprep.mubr.bf16.mxu0 %v2325_v2  ;;  %1386 = vmatprep.mubr.bf16.mxu1 %v2325_v2 }
  0xed   : > { %v828_v10 = vpop.f32.mrf.mxu0  ;;  %1067 = vmatmul.mubr.bf16.gmra.mxu0 %v2301_v6  ;;  %v1148_v11 = vpop.f32.mrf.mxu1  ;;  %1387 = vmatmul.mubr.bf16.gmra.mxu1 %v2302_v7 }
  0xee   : > { %v1149_v13 = vadd.f32 %v1148_v11, %v2513_v9  ;;  %1076 = vmatprep.mubr.bf16.mxu0 %v2325_v2  ;;  %1396 = vmatprep.mubr.bf16.mxu1 %v2325_v2  ;;  %v829_v14 = vadd.f32 %v828_v10, %v2513_v9 }
  0xef   : > { %v830_v15 = vpop.f32.mrf.mxu0  ;;  %v1150_v16 = vpop.f32.mrf.mxu1 }
  0xf0   : > { %v831_v17 = vadd.f32 %v830_v15, %v2515_v12  ;;  %v1151_v18 = vadd.f32 %v1150_v16, %v2515_v12  ;;  %v1595_v23 = vmax.f32 %v1149_v13, 0.0  ;;  %v1467_v26 = vmax.f32 %v829_v14, 0.0 }
  0xf1   : > { %v832_v19 = vpop.f32.mrf.mxu0  ;;  %v1152_v20 = vpop.f32.mrf.mxu1 }
  0xf2   : > { %v833_v24 = vadd.f32 %v832_v19, %v2513_v9  ;;  %v1153_v25 = vadd.f32 %v1152_v20, %v2513_v9  ;;  %v1468_v33 = vmax.f32 %v831_v17, 0.0  ;;  %v1596_v34 = vmax.f32 %v1151_v18, 0.0 }
  0xf3   : > { %v834_v27 = vpop.f32.mrf.mxu0  ;;  %v1154_v28 = vpop.f32.mrf.mxu1 }
  0xf4   : > { %v1469_v29 = vmax.f32 %v833_v24, 0.0  ;;  %v1597_v30 = vmax.f32 %v1153_v25, 0.0  ;;  %v835_v31 = vadd.f32 %v834_v27, %v2515_v12  ;;  %v1155_v32 = vadd.f32 %v1154_v28, %v2515_v12  ;;  %v2308_v27 = vld [vmem:[%s2383_s5 + $0x1d8] sm:$0xff]  }
  0xf5   : > { %v838_v35 = vpop.f32.mrf.mxu0  ;;  %1077 = vmatmul.mubr.bf16.gmra.mxu0 %v2303_v21  ;;  %v1158_v36 = vpop.f32.mrf.mxu1  ;;  %1397 = vmatmul.mubr.bf16.gmra.mxu1 %v2304_v22 }
  0xf6   : > { %v1723_v37 = vadd.f32 %v1469_v29, %v1467_v26  ;;  %v1871_v38 = vadd.f32 %v1597_v30, %v1595_v23  ;;  %v1470_v39 = vmax.f32 %v835_v31, 0.0  ;;  %v1598_v40 = vmax.f32 %v1155_v32, 0.0  ;;  %1086 = vmatprep.mubr.bf16.mxu0 %v2325_v2  ;;  %1406 = vmatprep.mubr.bf16.mxu1 %v2325_v2  ;;  %v2307_v26 = vld [vmem:[%s2383_s5 + $0xd8] sm:$0xff]  }
  0xf7   : > { %v839_v41 = vadd.f32 %v838_v35, %v2513_v9  ;;  %v1159_v42 = vadd.f32 %v1158_v36, %v2513_v9  ;;  %v840_v43 = vpop.f32.mrf.mxu0  ;;  %v1160_v44 = vpop.f32.mrf.mxu1 }
  0xf8   : > { %v1760_v45 = vadd.f32 %v1470_v39, %v1468_v33  ;;  %v1908_v46 = vadd.f32 %v1598_v40, %v1596_v34  ;;  %v841_v47 = vadd.f32 %v840_v43, %v2515_v12  ;;  %v1161_v48 = vadd.f32 %v1160_v44, %v2515_v12 }
  0xf9   : > { %v1471_v49 = vmax.f32 %v839_v41, 0.0  ;;  %v1599_v50 = vmax.f32 %v1159_v42, 0.0  ;;  %v842_v51 = vpop.f32.mrf.mxu0  ;;  %v1162_v52 = vpop.f32.mrf.mxu1 }
  0xfa   : > { %v1472_v55 = vmax.f32 %v841_v47, 0.0  ;;  %v1600_v56 = vmax.f32 %v1161_v48, 0.0  ;;  %v843_v57 = vadd.f32 %v842_v51, %v2513_v9  ;;  %v1163_v58 = vadd.f32 %v1162_v52, %v2513_v9 }
  0xfb   : > { %v1724_v59 = vadd.f32 %v1723_v37, %v1471_v49  ;;  %v1872_v60 = vadd.f32 %v1871_v38, %v1599_v50  ;;  %v844_v61 = vpop.f32.mrf.mxu0  ;;  %v1164_v62 = vpop.f32.mrf.mxu1 }
  0xfc   : > { %v1761_v63 = vadd.f32 %v1760_v45, %v1472_v55  ;;  %v1909_v0 = vadd.f32 %v1908_v46, %v1600_v56  ;;  %v1473_v1 = vmax.f32 %v843_v57, 0.0  ;;  %v1601_v3 = vmax.f32 %v1163_v58, 0.0 }
  0xfd   : > { %v845_v4 = vadd.f32 %v844_v61, %v2515_v12  ;;  %v1165_v5 = vadd.f32 %v1164_v62, %v2515_v12  ;;  %v848_v6 = vpop.f32.mrf.mxu0  ;;  %1087 = vmatmul.mubr.bf16.gmra.mxu0 %v2305_v53  ;;  %v1168_v7 = vpop.f32.mrf.mxu1  ;;  %1407 = vmatmul.mubr.bf16.gmra.mxu1 %v2306_v54  ;;  %v2310_v61 = vld [vmem:[%s2383_s5 + $0x1e0] sm:$0xff]  }
  0xfe   : > { %v1725_v8 = vadd.f32 %v1724_v59, %v1473_v1  ;;  %v1873_v10 = vadd.f32 %v1872_v60, %v1601_v3  ;;  %v849_v11 = vadd.f32 %v848_v6, %v2513_v9  ;;  %v1169_v13 = vadd.f32 %v1168_v7, %v2513_v9  ;;  %1096 = vmatprep.mubr.bf16.mxu0 %v2325_v2  ;;  %v2309_v60 = vld [vmem:[%s2383_s5 + $0xe0] sm:$0xff]  }
  0xff   : > { %v1474_v14 = vmax.f32 %v845_v4, 0.0  ;;  %v1602_v15 = vmax.f32 %v1165_v5, 0.0  ;;  %v850_v16 = vpop.f32.mrf.mxu0  ;;  %v1170_v17 = vpop.f32.mrf.mxu1  ;;  %1416 = vmatprep.mubr.bf16.mxu1 %v2325_v2 }
 0x100   : > { %v1475_v18 = vmax.f32 %v849_v11, 0.0  ;;  %v1603_v19 = vmax.f32 %v1169_v13, 0.0  ;;  %v851_v20 = vadd.f32 %v850_v16, %v2515_v12  ;;  %v1171_v21 = vadd.f32 %v1170_v17, %v2515_v12 }
 0x101   : > { %v1762_v22 = vadd.f32 %v1761_v63, %v1474_v14  ;;  %v1910_v23 = vadd.f32 %v1909_v0, %v1602_v15  ;;  %v852_v24 = vpop.f32.mrf.mxu0  ;;  %v1172_v25 = vpop.f32.mrf.mxu1 }
 0x102   : > { %v1726_v28 = vadd.f32 %v1725_v8, %v1475_v18  ;;  %v1874_v29 = vadd.f32 %v1873_v10, %v1603_v19  ;;  %v1476_v30 = vmax.f32 %v851_v20, 0.0  ;;  %v1604_v31 = vmax.f32 %v1171_v21, 0.0 }
 0x103   : > { %v853_v32 = vadd.f32 %v852_v24, %v2513_v9  ;;  %v1173_v33 = vadd.f32 %v1172_v25, %v2513_v9  ;;  %v854_v34 = vpop.f32.mrf.mxu0  ;;  %v1174_v35 = vpop.f32.mrf.mxu1 }
 0x104   : > { %v1763_v36 = vadd.f32 %v1762_v22, %v1476_v30  ;;  %v1911_v37 = vadd.f32 %v1910_v23, %v1604_v31  ;;  %v855_v38 = vadd.f32 %v854_v34, %v2515_v12  ;;  %v1175_v39 = vadd.f32 %v1174_v35, %v2515_v12  ;;  %v2312_v34 = vld [vmem:[%s2383_s5 + $0x1e8] sm:$0xff]  }
 0x105   : > { %v1477_v40 = vmax.f32 %v853_v32, 0.0  ;;  %v1605_v41 = vmax.f32 %v1173_v33, 0.0  ;;  %v858_v42 = vpop.f32.mrf.mxu0  ;;  %1097 = vmatmul.mubr.bf16.gmra.mxu0 %v2307_v26  ;;  %v1178_v43 = vpop.f32.mrf.mxu1  ;;  %1417 = vmatmul.mubr.bf16.gmra.mxu1 %v2308_v27  ;;  %v2311_v33 = vld [vmem:[%s2383_s5 + $0xe8] sm:$0xff]  }
 0x106   : > { %v1478_v44 = vmax.f32 %v855_v38, 0.0  ;;  %v1606_v45 = vmax.f32 %v1175_v39, 0.0  ;;  %v859_v46 = vadd.f32 %v858_v42, %v2513_v9  ;;  %v1179_v47 = vadd.f32 %v1178_v43, %v2513_v9  ;;  %1106 = vmatprep.mubr.bf16.mxu0 %v2325_v2  ;;  %1426 = vmatprep.mubr.bf16.mxu1 %v2325_v2 }
 0x107   : > { %v1727_v48 = vadd.f32 %v1726_v28, %v1477_v40  ;;  %v1875_v49 = vadd.f32 %v1874_v29, %v1605_v41  ;;  %v860_v50 = vpop.f32.mrf.mxu0  ;;  %v1180_v51 = vpop.f32.mrf.mxu1 }
 0x108   : > { %v1764_v52 = vadd.f32 %v1763_v36, %v1478_v44  ;;  %v1912_v53 = vadd.f32 %v1911_v37, %v1606_v45  ;;  %v1479_v54 = vmax.f32 %v859_v46, 0.0  ;;  %v1607_v55 = vmax.f32 %v1179_v47, 0.0 }
 0x109   : > { %v861_v56 = vadd.f32 %v860_v50, %v2515_v12  ;;  %v1181_v57 = vadd.f32 %v1180_v51, %v2515_v12  ;;  %v862_v58 = vpop.f32.mrf.mxu0  ;;  %v1182_v59 = vpop.f32.mrf.mxu1 }
 0x10a   : > { %v1728_v62 = vadd.f32 %v1727_v48, %v1479_v54  ;;  %v1876_v63 = vadd.f32 %v1875_v49, %v1607_v55  ;;  %v863_v0 = vadd.f32 %v862_v58, %v2513_v9  ;;  %v1183_v1 = vadd.f32 %v1182_v59, %v2513_v9 }
 0x10b   : > { %v1480_v3 = vmax.f32 %v861_v56, 0.0  ;;  %v1608_v4 = vmax.f32 %v1181_v57, 0.0  ;;  %v864_v5 = vpop.f32.mrf.mxu0  ;;  %v1184_v6 = vpop.f32.mrf.mxu1 }
 0x10c   : > { %v1481_v7 = vmax.f32 %v863_v0, 0.0  ;;  %v1609_v8 = vmax.f32 %v1183_v1, 0.0  ;;  %v865_v10 = vadd.f32 %v864_v5, %v2515_v12  ;;  %v1185_v11 = vadd.f32 %v1184_v6, %v2515_v12  ;;  %v2314_v5 = vld [vmem:[%s2383_s5 + $0x1f0] sm:$0xff]  }
 0x10d   : > { %v1765_v13 = vadd.f32 %v1764_v52, %v1480_v3  ;;  %v1913_v14 = vadd.f32 %v1912_v53, %v1608_v4  ;;  %v868_v15 = vpop.f32.mrf.mxu0  ;;  %1107 = vmatmul.mubr.bf16.gmra.mxu0 %v2309_v60  ;;  %v1188_v16 = vpop.f32.mrf.mxu1  ;;  %1427 = vmatmul.mubr.bf16.gmra.mxu1 %v2310_v61  ;;  %v2313_v4 = vld [vmem:[%s2383_s5 + $0xf0] sm:$0xff]  }
 0x10e   : > { %v1729_v17 = vadd.f32 %v1728_v62, %v1481_v7  ;;  %v1877_v18 = vadd.f32 %v1876_v63, %v1609_v8  ;;  %v1482_v19 = vmax.f32 %v865_v10, 0.0  ;;  %v1610_v20 = vmax.f32 %v1185_v11, 0.0  ;;  %1116 = vmatprep.mubr.bf16.mxu0 %v2325_v2  ;;  %1436 = vmatprep.mubr.bf16.mxu1 %v2325_v2 }
 0x10f   : > { %v869_v21 = vadd.f32 %v868_v15, %v2513_v9  ;;  %v1189_v22 = vadd.f32 %v1188_v16, %v2513_v9  ;;  %v870_v23 = vpop.f32.mrf.mxu0  ;;  %v1190_v24 = vpop.f32.mrf.mxu1 }
 0x110   : > { %v1766_v25 = vadd.f32 %v1765_v13, %v1482_v19  ;;  %v1914_v26 = vadd.f32 %v1913_v14, %v1610_v20  ;;  %v871_v27 = vadd.f32 %v870_v23, %v2515_v12  ;;  %v1191_v28 = vadd.f32 %v1190_v24, %v2515_v12 }
 0x111   : > { %v1483_v29 = vmax.f32 %v869_v21, 0.0  ;;  %v1611_v30 = vmax.f32 %v1189_v22, 0.0  ;;  %v872_v31 = vpop.f32.mrf.mxu0  ;;  %v1192_v32 = vpop.f32.mrf.mxu1 }
 0x112   : > { %v1484_v35 = vmax.f32 %v871_v27, 0.0  ;;  %v1612_v36 = vmax.f32 %v1191_v28, 0.0  ;;  %v873_v37 = vadd.f32 %v872_v31, %v2513_v9  ;;  %v1193_v38 = vadd.f32 %v1192_v32, %v2513_v9 }
 0x113   : > { %v1730_v39 = vadd.f32 %v1729_v17, %v1483_v29  ;;  %v1878_v40 = vadd.f32 %v1877_v18, %v1611_v30  ;;  %v874_v41 = vpop.f32.mrf.mxu0  ;;  %v1194_v42 = vpop.f32.mrf.mxu1 }
 0x114   : > { %v1767_v43 = vadd.f32 %v1766_v25, %v1484_v35  ;;  %v1915_v44 = vadd.f32 %v1914_v26, %v1612_v36  ;;  %v1485_v45 = vmax.f32 %v873_v37, 0.0  ;;  %v1613_v46 = vmax.f32 %v1193_v38, 0.0 }
 0x115   : > { %v875_v47 = vadd.f32 %v874_v41, %v2515_v12  ;;  %v1195_v48 = vadd.f32 %v1194_v42, %v2515_v12  ;;  %v878_v49 = vpop.f32.mrf.mxu0  ;;  %1117 = vmatmul.mubr.bf16.gmra.mxu0 %v2311_v33  ;;  %v1198_v50 = vpop.f32.mrf.mxu1  ;;  %1437 = vmatmul.mubr.bf16.gmra.mxu1 %v2312_v34  ;;  %v2316_v41 = vld [vmem:[%s2383_s5 + $0x1f8] sm:$0xff]  }
 0x116   : > { %v1731_v51 = vadd.f32 %v1730_v39, %v1485_v45  ;;  %v1879_v52 = vadd.f32 %v1878_v40, %v1613_v46  ;;  %v879_v53 = vadd.f32 %v878_v49, %v2513_v9  ;;  %v1199_v54 = vadd.f32 %v1198_v50, %v2513_v9  ;;  %1126 = vmatprep.mubr.bf16.mxu0 %v2325_v2  ;;  %v2315_v40 = vld [vmem:[%s2383_s5 + $0xf8] sm:$0xff]  }
 0x117   : > { %v1486_v55 = vmax.f32 %v875_v47, 0.0  ;;  %v1614_v56 = vmax.f32 %v1195_v48, 0.0  ;;  %v880_v57 = vpop.f32.mrf.mxu0  ;;  %v1200_v58 = vpop.f32.mrf.mxu1  ;;  %1446 = vmatprep.mubr.bf16.mxu1 %v2325_v2 }
 0x118   : > { %v1487_v59 = vmax.f32 %v879_v53, 0.0  ;;  %v1615_v60 = vmax.f32 %v1199_v54, 0.0  ;;  %v881_v61 = vadd.f32 %v880_v57, %v2515_v12  ;;  %v1201_v62 = vadd.f32 %v1200_v58, %v2515_v12 }
 0x119   : > { %v1768_v63 = vadd.f32 %v1767_v43, %v1486_v55  ;;  %v1916_v0 = vadd.f32 %v1915_v44, %v1614_v56  ;;  %v882_v1 = vpop.f32.mrf.mxu0  ;;  %v1202_v3 = vpop.f32.mrf.mxu1 }
 0x11a   : > { %v1732_v6 = vadd.f32 %v1731_v51, %v1487_v59  ;;  %v1880_v7 = vadd.f32 %v1879_v52, %v1615_v60  ;;  %v1488_v8 = vmax.f32 %v881_v61, 0.0  ;;  %v1616_v10 = vmax.f32 %v1201_v62, 0.0 }
 0x11b   : > { %v883_v11 = vadd.f32 %v882_v1, %v2513_v9  ;;  %v1203_v13 = vadd.f32 %v1202_v3, %v2513_v9  ;;  %v884_v14 = vpop.f32.mrf.mxu0  ;;  %v1204_v15 = vpop.f32.mrf.mxu1 }
 0x11c   : > { %v1769_v16 = vadd.f32 %v1768_v63, %v1488_v8  ;;  %v1917_v17 = vadd.f32 %v1916_v0, %v1616_v10  ;;  %v885_v18 = vadd.f32 %v884_v14, %v2515_v12  ;;  %v1205_v19 = vadd.f32 %v1204_v15, %v2515_v12 }
 0x11d   : > { %v1489_v20 = vmax.f32 %v883_v11, 0.0  ;;  %v1617_v21 = vmax.f32 %v1203_v13, 0.0  ;;  %v888_v22 = vpop.f32.mrf.mxu0  ;;  %1127 = vmatmul.mubr.bf16.gmra.mxu0 %v2313_v4  ;;  %v1208_v23 = vpop.f32.mrf.mxu1  ;;  %1447 = vmatmul.mubr.bf16.gmra.mxu1 %v2314_v5 }
 0x11e   : > { %v1490_v24 = vmax.f32 %v885_v18, 0.0  ;;  %v1618_v25 = vmax.f32 %v1205_v19, 0.0  ;;  %v889_v26 = vadd.f32 %v888_v22, %v2513_v9  ;;  %v1209_v27 = vadd.f32 %v1208_v23, %v2513_v9  ;;  %1136 = vmatprep.mubr.bf16.mxu0 %v2325_v2  ;;  %1456 = vmatprep.mubr.bf16.mxu1 %v2325_v2 }
 0x11f   : > { %v1733_v28 = vadd.f32 %v1732_v6, %v1489_v20  ;;  %v1881_v29 = vadd.f32 %v1880_v7, %v1617_v21  ;;  %v890_v30 = vpop.f32.mrf.mxu0  ;;  %v1210_v31 = vpop.f32.mrf.mxu1 }
 0x120   : > { %v1770_v32 = vadd.f32 %v1769_v16, %v1490_v24  ;;  %v1918_v33 = vadd.f32 %v1917_v17, %v1618_v25  ;;  %v1491_v34 = vmax.f32 %v889_v26, 0.0  ;;  %v1619_v35 = vmax.f32 %v1209_v27, 0.0 }
 0x121   : > { %v891_v36 = vadd.f32 %v890_v30, %v2515_v12  ;;  %v1211_v37 = vadd.f32 %v1210_v31, %v2515_v12  ;;  %v892_v38 = vpop.f32.mrf.mxu0  ;;  %v1212_v39 = vpop.f32.mrf.mxu1 }
 0x122   : > { %v1734_v42 = vadd.f32 %v1733_v28, %v1491_v34  ;;  %v1882_v43 = vadd.f32 %v1881_v29, %v1619_v35  ;;  %v893_v2 = vadd.f32 %v892_v38, %v2513_v9  ;;  %v1213_v44 = vadd.f32 %v1212_v39, %v2513_v9 }
 0x123   : > { %v1492_v45 = vmax.f32 %v891_v36, 0.0  ;;  %v1620_v46 = vmax.f32 %v1211_v37, 0.0  ;;  %v894_v47 = vpop.f32.mrf.mxu0  ;;  %v1214_v48 = vpop.f32.mrf.mxu1 }
 0x124   : > { %v1493_v49 = vmax.f32 %v893_v2, 0.0  ;;  %v1621_v50 = vmax.f32 %v1213_v44, 0.0  ;;  %v895_v51 = vadd.f32 %v894_v47, %v2515_v12  ;;  %v1215_v52 = vadd.f32 %v1214_v48, %v2515_v12 }
 0x125   : > { %v1771_v53 = vadd.f32 %v1770_v32, %v1492_v45  ;;  %v1919_v54 = vadd.f32 %v1918_v33, %v1620_v46  ;;  %v898_v55 = vpop.f32.mrf.mxu0  ;;  %1137 = vmatmul.mubr.bf16.gmra.mxu0 %v2315_v40  ;;  %v1218_v56 = vpop.f32.mrf.mxu1  ;;  %1457 = vmatmul.mubr.bf16.gmra.mxu1 %v2316_v41 }
 0x126   : > { %v1735_v57 = vadd.f32 %v1734_v42, %v1493_v49  ;;  %v1883_v58 = vadd.f32 %v1882_v43, %v1621_v50  ;;  %v1494_v59 = vmax.f32 %v895_v51, 0.0  ;;  %v1622_v60 = vmax.f32 %v1215_v52, 0.0 }
 0x127   : > { %v899_v61 = vadd.f32 %v898_v55, %v2513_v9  ;;  %v1219_v62 = vadd.f32 %v1218_v56, %v2513_v9  ;;  %v900_v63 = vpop.f32.mrf.mxu0  ;;  %v1220_v0 = vpop.f32.mrf.mxu1 }
 0x128   : > { %v1772_v1 = vadd.f32 %v1771_v53, %v1494_v59  ;;  %v1920_v3 = vadd.f32 %v1919_v54, %v1622_v60  ;;  %v901_v4 = vadd.f32 %v900_v63, %v2515_v12  ;;  %v1221_v5 = vadd.f32 %v1220_v0, %v2515_v12 }
 0x129   : > { %v1495_v6 = vmax.f32 %v899_v61, 0.0  ;;  %v1623_v7 = vmax.f32 %v1219_v62, 0.0  ;;  %v902_v8 = vpop.f32.mrf.mxu0  ;;  %v1222_v10 = vpop.f32.mrf.mxu1 }
 0x12a   : > { %v1496_v11 = vmax.f32 %v901_v4, 0.0  ;;  %v1624_v13 = vmax.f32 %v1221_v5, 0.0  ;;  %v903_v14 = vadd.f32 %v902_v8, %v2513_v9  ;;  %v1223_v15 = vadd.f32 %v1222_v10, %v2513_v9 }
 0x12b   : > { %v1736_v16 = vadd.f32 %v1735_v57, %v1495_v6  ;;  %v1884_v17 = vadd.f32 %v1883_v58, %v1623_v7  ;;  %v904_v18 = vpop.f32.mrf.mxu0  ;;  %v1224_v19 = vpop.f32.mrf.mxu1 }
 0x12c   : > { %v1773_v20 = vadd.f32 %v1772_v1, %v1496_v11  ;;  %v1921_v21 = vadd.f32 %v1920_v3, %v1624_v13  ;;  %v1497_v22 = vmax.f32 %v903_v14, 0.0  ;;  %v1625_v23 = vmax.f32 %v1223_v15, 0.0 }
 0x12d   : > { %v905_v24 = vadd.f32 %v904_v18, %v2515_v12  ;;  %v1225_v25 = vadd.f32 %v1224_v19, %v2515_v12  ;;  %v908_v26 = vpop.f32.mrf.mxu0  ;;  %v1228_v27 = vpop.f32.mrf.mxu1 }
 0x12e   : > { %v1737_v28 = vadd.f32 %v1736_v16, %v1497_v22  ;;  %v1885_v29 = vadd.f32 %v1884_v17, %v1625_v23  ;;  %v909_v30 = vadd.f32 %v908_v26, %v2513_v9  ;;  %v1229_v31 = vadd.f32 %v1228_v27, %v2513_v9 }
 0x12f   : > { %v1498_v32 = vmax.f32 %v905_v24, 0.0  ;;  %v1626_v33 = vmax.f32 %v1225_v25, 0.0  ;;  %v910_v34 = vpop.f32.mrf.mxu0  ;;  %v1230_v35 = vpop.f32.mrf.mxu1 }
 0x130   : > { %v1499_v36 = vmax.f32 %v909_v30, 0.0  ;;  %v1627_v37 = vmax.f32 %v1229_v31, 0.0  ;;  %v911_v38 = vadd.f32 %v910_v34, %v2515_v12  ;;  %v1231_v39 = vadd.f32 %v1230_v35, %v2515_v12 }
 0x131   : > { %v1774_v40 = vadd.f32 %v1773_v20, %v1498_v32  ;;  %v1922_v41 = vadd.f32 %v1921_v21, %v1626_v33  ;;  %v912_v42 = vpop.f32.mrf.mxu0  ;;  %v1232_v43 = vpop.f32.mrf.mxu1 }
 0x132   : > { %v1738_v2 = vadd.f32 %v1737_v28, %v1499_v36  ;;  %v1886_v44 = vadd.f32 %v1885_v29, %v1627_v37  ;;  %v1500_v45 = vmax.f32 %v911_v38, 0.0  ;;  %v1628_v46 = vmax.f32 %v1231_v39, 0.0 }
 0x133   : > { %v913_v47 = vadd.f32 %v912_v42, %v2513_v9  ;;  %v1233_v48 = vadd.f32 %v1232_v43, %v2513_v9  ;;  %v914_v49 = vpop.f32.mrf.mxu0  ;;  %v1234_v50 = vpop.f32.mrf.mxu1 }
 0x134   : > { %v1775_v51 = vadd.f32 %v1774_v40, %v1500_v45  ;;  %v1923_v52 = vadd.f32 %v1922_v41, %v1628_v46  ;;  %v915_v53 = vadd.f32 %v914_v49, %v2515_v12  ;;  %v1235_v54 = vadd.f32 %v1234_v50, %v2515_v12 }
 0x135   : > { %v1501_v55 = vmax.f32 %v913_v47, 0.0  ;;  %v1629_v56 = vmax.f32 %v1233_v48, 0.0  ;;  %v918_v57 = vpop.f32.mrf.mxu0  ;;  %v1238_v58 = vpop.f32.mrf.mxu1 }
 0x136   : > { %v1502_v59 = vmax.f32 %v915_v53, 0.0  ;;  %v1630_v60 = vmax.f32 %v1235_v54, 0.0  ;;  %v919_v61 = vadd.f32 %v918_v57, %v2513_v9  ;;  %v1239_v62 = vadd.f32 %v1238_v58, %v2513_v9 }
 0x137   : > { %v1739_v63 = vadd.f32 %v1738_v2, %v1501_v55  ;;  %v1887_v0 = vadd.f32 %v1886_v44, %v1629_v56  ;;  %v920_v1 = vpop.f32.mrf.mxu0  ;;  %v1240_v3 = vpop.f32.mrf.mxu1 }
 0x138   : > { %v1776_v4 = vadd.f32 %v1775_v51, %v1502_v59  ;;  %v1924_v5 = vadd.f32 %v1923_v52, %v1630_v60  ;;  %v1503_v6 = vmax.f32 %v919_v61, 0.0  ;;  %v1631_v7 = vmax.f32 %v1239_v62, 0.0 }
 0x139   : > { %v921_v8 = vadd.f32 %v920_v1, %v2515_v12  ;;  %v1241_v10 = vadd.f32 %v1240_v3, %v2515_v12  ;;  %v922_v11 = vpop.f32.mrf.mxu0  ;;  %v1242_v13 = vpop.f32.mrf.mxu1 }
 0x13a   : > { %v1740_v14 = vadd.f32 %v1739_v63, %v1503_v6  ;;  %v1888_v15 = vadd.f32 %v1887_v0, %v1631_v7  ;;  %v923_v16 = vadd.f32 %v922_v11, %v2513_v9  ;;  %v1243_v17 = vadd.f32 %v1242_v13, %v2513_v9 }
 0x13b   : > { %v1504_v18 = vmax.f32 %v921_v8, 0.0  ;;  %v1632_v19 = vmax.f32 %v1241_v10, 0.0  ;;  %v924_v20 = vpop.f32.mrf.mxu0  ;;  %v1244_v21 = vpop.f32.mrf.mxu1 }
 0x13c   : > { %v1505_v22 = vmax.f32 %v923_v16, 0.0  ;;  %v1633_v23 = vmax.f32 %v1243_v17, 0.0  ;;  %v925_v24 = vadd.f32 %v924_v20, %v2515_v12  ;;  %v1245_v25 = vadd.f32 %v1244_v21, %v2515_v12 }
 0x13d   : > { %v1777_v26 = vadd.f32 %v1776_v4, %v1504_v18  ;;  %v1925_v27 = vadd.f32 %v1924_v5, %v1632_v19  ;;  %v928_v28 = vpop.f32.mrf.mxu0  ;;  %v1248_v29 = vpop.f32.mrf.mxu1 }
 0x13e   : > { %v1741_v30 = vadd.f32 %v1740_v14, %v1505_v22  ;;  %v1889_v31 = vadd.f32 %v1888_v15, %v1633_v23  ;;  %v1506_v32 = vmax.f32 %v925_v24, 0.0  ;;  %v1634_v33 = vmax.f32 %v1245_v25, 0.0 }
 0x13f   : > { %v929_v34 = vadd.f32 %v928_v28, %v2513_v9  ;;  %v1249_v35 = vadd.f32 %v1248_v29, %v2513_v9  ;;  %v930_v36 = vpop.f32.mrf.mxu0  ;;  %v1250_v37 = vpop.f32.mrf.mxu1 }
 0x140   : > { %v1778_v38 = vadd.f32 %v1777_v26, %v1506_v32  ;;  %v1926_v39 = vadd.f32 %v1925_v27, %v1634_v33  ;;  %v931_v40 = vadd.f32 %v930_v36, %v2515_v12  ;;  %v1251_v41 = vadd.f32 %v1250_v37, %v2515_v12 }
 0x141   : > { %v1507_v42 = vmax.f32 %v929_v34, 0.0  ;;  %v1635_v43 = vmax.f32 %v1249_v35, 0.0  ;;  %v932_v2 = vpop.f32.mrf.mxu0  ;;  %v1252_v44 = vpop.f32.mrf.mxu1 }
 0x142   : > { %v1508_v45 = vmax.f32 %v931_v40, 0.0  ;;  %v1636_v46 = vmax.f32 %v1251_v41, 0.0  ;;  %v933_v47 = vadd.f32 %v932_v2, %v2513_v9  ;;  %v1253_v48 = vadd.f32 %v1252_v44, %v2513_v9 }
 0x143   : > { %v1742_v49 = vadd.f32 %v1741_v30, %v1507_v42  ;;  %v1890_v50 = vadd.f32 %v1889_v31, %v1635_v43  ;;  %v934_v51 = vpop.f32.mrf.mxu0  ;;  %v1254_v52 = vpop.f32.mrf.mxu1 }
 0x144   : > { %v1779_v53 = vadd.f32 %v1778_v38, %v1508_v45  ;;  %v1927_v54 = vadd.f32 %v1926_v39, %v1636_v46  ;;  %v1509_v55 = vmax.f32 %v933_v47, 0.0  ;;  %v1637_v56 = vmax.f32 %v1253_v48, 0.0 }
 0x145   : > { %v935_v57 = vadd.f32 %v934_v51, %v2515_v12  ;;  %v1255_v58 = vadd.f32 %v1254_v52, %v2515_v12  ;;  %v938_v59 = vpop.f32.mrf.mxu0  ;;  %v1258_v60 = vpop.f32.mrf.mxu1 }
 0x146   : > { %v1743_v61 = vadd.f32 %v1742_v49, %v1509_v55  ;;  %v1891_v62 = vadd.f32 %v1890_v50, %v1637_v56  ;;  %v939_v63 = vadd.f32 %v938_v59, %v2513_v9  ;;  %v1259_v0 = vadd.f32 %v1258_v60, %v2513_v9 }
 0x147   : > { %v1510_v1 = vmax.f32 %v935_v57, 0.0  ;;  %v1638_v3 = vmax.f32 %v1255_v58, 0.0  ;;  %v940_v4 = vpop.f32.mrf.mxu0  ;;  %v1260_v5 = vpop.f32.mrf.mxu1 }
 0x148   : > { %v1511_v6 = vmax.f32 %v939_v63, 0.0  ;;  %v1639_v7 = vmax.f32 %v1259_v0, 0.0  ;;  %v941_v8 = vadd.f32 %v940_v4, %v2515_v12  ;;  %v1261_v10 = vadd.f32 %v1260_v5, %v2515_v12 }
 0x149   : > { %v1780_v11 = vadd.f32 %v1779_v53, %v1510_v1  ;;  %v1928_v13 = vadd.f32 %v1927_v54, %v1638_v3  ;;  %v942_v14 = vpop.f32.mrf.mxu0  ;;  %v1262_v15 = vpop.f32.mrf.mxu1 }
 0x14a   : > { %v1744_v16 = vadd.f32 %v1743_v61, %v1511_v6  ;;  %v1892_v17 = vadd.f32 %v1891_v62, %v1639_v7  ;;  %v1512_v18 = vmax.f32 %v941_v8, 0.0  ;;  %v1640_v19 = vmax.f32 %v1261_v10, 0.0 }
 0x14b   : > { %v943_v20 = vadd.f32 %v942_v14, %v2513_v9  ;;  %v1263_v21 = vadd.f32 %v1262_v15, %v2513_v9  ;;  %v944_v22 = vpop.f32.mrf.mxu0  ;;  %v1264_v23 = vpop.f32.mrf.mxu1 }
 0x14c   : > { %v1781_v24 = vadd.f32 %v1780_v11, %v1512_v18  ;;  %v1929_v25 = vadd.f32 %v1928_v13, %v1640_v19  ;;  %v945_v26 = vadd.f32 %v944_v22, %v2515_v12  ;;  %v1265_v27 = vadd.f32 %v1264_v23, %v2515_v12 }
 0x14d   : > { %v1513_v28 = vmax.f32 %v943_v20, 0.0  ;;  %v1641_v29 = vmax.f32 %v1263_v21, 0.0  ;;  %v948_v30 = vpop.f32.mrf.mxu0  ;;  %v1268_v31 = vpop.f32.mrf.mxu1 }
 0x14e   : > { %v1514_v32 = vmax.f32 %v945_v26, 0.0  ;;  %v1642_v33 = vmax.f32 %v1265_v27, 0.0  ;;  %v949_v34 = vadd.f32 %v948_v30, %v2513_v9  ;;  %v1269_v35 = vadd.f32 %v1268_v31, %v2513_v9 }
 0x14f   : > { %v1745_v36 = vadd.f32 %v1744_v16, %v1513_v28  ;;  %v1893_v37 = vadd.f32 %v1892_v17, %v1641_v29  ;;  %v950_v38 = vpop.f32.mrf.mxu0  ;;  %v1270_v39 = vpop.f32.mrf.mxu1 }
 0x150   : > { %v1782_v40 = vadd.f32 %v1781_v24, %v1514_v32  ;;  %v1930_v41 = vadd.f32 %v1929_v25, %v1642_v33  ;;  %v1515_v42 = vmax.f32 %v949_v34, 0.0  ;;  %v1643_v43 = vmax.f32 %v1269_v35, 0.0 }
 0x151   : > { %v951_v2 = vadd.f32 %v950_v38, %v2515_v12  ;;  %v1271_v44 = vadd.f32 %v1270_v39, %v2515_v12  ;;  %v952_v45 = vpop.f32.mrf.mxu0  ;;  %v1272_v46 = vpop.f32.mrf.mxu1 }
 0x152   : > { %v1746_v47 = vadd.f32 %v1745_v36, %v1515_v42  ;;  %v1894_v48 = vadd.f32 %v1893_v37, %v1643_v43  ;;  %v953_v49 = vadd.f32 %v952_v45, %v2513_v9  ;;  %v1273_v50 = vadd.f32 %v1272_v46, %v2513_v9 }
 0x153   : > { %v1516_v51 = vmax.f32 %v951_v2, 0.0  ;;  %v1644_v52 = vmax.f32 %v1271_v44, 0.0  ;;  %v954_v53 = vpop.f32.mrf.mxu0  ;;  %v1274_v54 = vpop.f32.mrf.mxu1 }
 0x154   : > { %v1517_v55 = vmax.f32 %v953_v49, 0.0  ;;  %v1645_v56 = vmax.f32 %v1273_v50, 0.0  ;;  %v955_v57 = vadd.f32 %v954_v53, %v2515_v12  ;;  %v1275_v58 = vadd.f32 %v1274_v54, %v2515_v12 }
 0x155   : > { %v1783_v59 = vadd.f32 %v1782_v40, %v1516_v51  ;;  %v1931_v60 = vadd.f32 %v1930_v41, %v1644_v52  ;;  %v958_v61 = vpop.f32.mrf.mxu0  ;;  %v1278_v62 = vpop.f32.mrf.mxu1 }
 0x156   : > { %v1747_v63 = vadd.f32 %v1746_v47, %v1517_v55  ;;  %v1895_v0 = vadd.f32 %v1894_v48, %v1645_v56  ;;  %v1518_v1 = vmax.f32 %v955_v57, 0.0  ;;  %v1646_v3 = vmax.f32 %v1275_v58, 0.0 }
 0x157   : > { %v959_v4 = vadd.f32 %v958_v61, %v2513_v9  ;;  %v1279_v5 = vadd.f32 %v1278_v62, %v2513_v9  ;;  %v960_v6 = vpop.f32.mrf.mxu0  ;;  %v1280_v7 = vpop.f32.mrf.mxu1 }
 0x158   : > { %v1784_v8 = vadd.f32 %v1783_v59, %v1518_v1  ;;  %v1932_v10 = vadd.f32 %v1931_v60, %v1646_v3  ;;  %v961_v11 = vadd.f32 %v960_v6, %v2515_v12  ;;  %v1281_v13 = vadd.f32 %v1280_v7, %v2515_v12 }
 0x159   : > { %v1519_v14 = vmax.f32 %v959_v4, 0.0  ;;  %v1647_v15 = vmax.f32 %v1279_v5, 0.0  ;;  %v962_v16 = vpop.f32.mrf.mxu0  ;;  %v1282_v17 = vpop.f32.mrf.mxu1 }
 0x15a   : > { %v1520_v18 = vmax.f32 %v961_v11, 0.0  ;;  %v1648_v19 = vmax.f32 %v1281_v13, 0.0  ;;  %v963_v20 = vadd.f32 %v962_v16, %v2513_v9  ;;  %v1283_v21 = vadd.f32 %v1282_v17, %v2513_v9 }
 0x15b   : > { %v1748_v22 = vadd.f32 %v1747_v63, %v1519_v14  ;;  %v1896_v23 = vadd.f32 %v1895_v0, %v1647_v15  ;;  %v964_v24 = vpop.f32.mrf.mxu0  ;;  %v1284_v25 = vpop.f32.mrf.mxu1 }
 0x15c   : > { %v1785_v26 = vadd.f32 %v1784_v8, %v1520_v18  ;;  %v1933_v27 = vadd.f32 %v1932_v10, %v1648_v19  ;;  %v1521_v28 = vmax.f32 %v963_v20, 0.0  ;;  %v1649_v29 = vmax.f32 %v1283_v21, 0.0 }
 0x15d   : > { %v965_v30 = vadd.f32 %v964_v24, %v2515_v12  ;;  %v1285_v31 = vadd.f32 %v1284_v25, %v2515_v12  ;;  %v968_v32 = vpop.f32.mrf.mxu0  ;;  %v1288_v33 = vpop.f32.mrf.mxu1 }
 0x15e   : > { %v1749_v34 = vadd.f32 %v1748_v22, %v1521_v28  ;;  %v1897_v35 = vadd.f32 %v1896_v23, %v1649_v29  ;;  %v969_v36 = vadd.f32 %v968_v32, %v2513_v9  ;;  %v1289_v37 = vadd.f32 %v1288_v33, %v2513_v9 }
 0x15f   : > { %v1522_v38 = vmax.f32 %v965_v30, 0.0  ;;  %v1650_v39 = vmax.f32 %v1285_v31, 0.0  ;;  %v970_v40 = vpop.f32.mrf.mxu0  ;;  %v1290_v41 = vpop.f32.mrf.mxu1 }
 0x160   : > { %v1523_v42 = vmax.f32 %v969_v36, 0.0  ;;  %v1651_v43 = vmax.f32 %v1289_v37, 0.0  ;;  %v971_v2 = vadd.f32 %v970_v40, %v2515_v12  ;;  %v1291_v44 = vadd.f32 %v1290_v41, %v2515_v12 }
 0x161   : > { %v1786_v45 = vadd.f32 %v1785_v26, %v1522_v38  ;;  %v1934_v46 = vadd.f32 %v1933_v27, %v1650_v39  ;;  %v972_v47 = vpop.f32.mrf.mxu0  ;;  %v1292_v48 = vpop.f32.mrf.mxu1 }
 0x162   : > { %v1750_v49 = vadd.f32 %v1749_v34, %v1523_v42  ;;  %v1898_v50 = vadd.f32 %v1897_v35, %v1651_v43  ;;  %v1524_v51 = vmax.f32 %v971_v2, 0.0  ;;  %v1652_v52 = vmax.f32 %v1291_v44, 0.0 }
 0x163   : > { %v973_v53 = vadd.f32 %v972_v47, %v2513_v9  ;;  %v1293_v54 = vadd.f32 %v1292_v48, %v2513_v9  ;;  %v974_v55 = vpop.f32.mrf.mxu0  ;;  %v1294_v56 = vpop.f32.mrf.mxu1 }
 0x164   : > { %v1787_v57 = vadd.f32 %v1786_v45, %v1524_v51  ;;  %v1935_v58 = vadd.f32 %v1934_v46, %v1652_v52  ;;  %v975_v59 = vadd.f32 %v974_v55, %v2515_v12  ;;  %v1295_v60 = vadd.f32 %v1294_v56, %v2515_v12 }
 0x165   : > { %v1525_v61 = vmax.f32 %v973_v53, 0.0  ;;  %v1653_v62 = vmax.f32 %v1293_v54, 0.0  ;;  %v978_v63 = vpop.f32.mrf.mxu0  ;;  %v1298_v0 = vpop.f32.mrf.mxu1 }
 0x166   : > { %v1526_v1 = vmax.f32 %v975_v59, 0.0  ;;  %v1654_v3 = vmax.f32 %v1295_v60, 0.0  ;;  %v979_v4 = vadd.f32 %v978_v63, %v2513_v9  ;;  %v1299_v5 = vadd.f32 %v1298_v0, %v2513_v9 }
 0x167   : > { %v1751_v6 = vadd.f32 %v1750_v49, %v1525_v61  ;;  %v1899_v7 = vadd.f32 %v1898_v50, %v1653_v62  ;;  %v980_v8 = vpop.f32.mrf.mxu0  ;;  %v1300_v10 = vpop.f32.mrf.mxu1 }
 0x168   : > { %v1788_v11 = vadd.f32 %v1787_v57, %v1526_v1  ;;  %v1936_v13 = vadd.f32 %v1935_v58, %v1654_v3  ;;  %v1527_v14 = vmax.f32 %v979_v4, 0.0  ;;  %v1655_v15 = vmax.f32 %v1299_v5, 0.0 }
 0x169   : > { %v981_v16 = vadd.f32 %v980_v8, %v2515_v12  ;;  %v1301_v17 = vadd.f32 %v1300_v10, %v2515_v12  ;;  %v982_v18 = vpop.f32.mrf.mxu0  ;;  %v1302_v19 = vpop.f32.mrf.mxu1 }
 0x16a   : > { %v1752_v20 = vadd.f32 %v1751_v6, %v1527_v14  ;;  %v1900_v21 = vadd.f32 %v1899_v7, %v1655_v15  ;;  %v983_v22 = vadd.f32 %v982_v18, %v2513_v9  ;;  %v1303_v23 = vadd.f32 %v1302_v19, %v2513_v9 }
 0x16b   : > { %v1528_v24 = vmax.f32 %v981_v16, 0.0  ;;  %v1656_v25 = vmax.f32 %v1301_v17, 0.0  ;;  %v984_v26 = vpop.f32.mrf.mxu0  ;;  %v1304_v27 = vpop.f32.mrf.mxu1 }
 0x16c   : > { %v1529_v28 = vmax.f32 %v983_v22, 0.0  ;;  %v1657_v29 = vmax.f32 %v1303_v23, 0.0  ;;  %v985_v30 = vadd.f32 %v984_v26, %v2515_v12  ;;  %v1305_v31 = vadd.f32 %v1304_v27, %v2515_v12 }
 0x16d   : > { %v1789_v32 = vadd.f32 %v1788_v11, %v1528_v24  ;;  %v1937_v33 = vadd.f32 %v1936_v13, %v1656_v25  ;;  %v2673_v34 = vpop.f32.mrf.mxu0  ;;  %v2675_v35 = vpop.f32.mrf.mxu1 }
 0x16e   : > { %v1753_v36 = vadd.f32 %v1752_v20, %v1529_v28  ;;  %v1901_v37 = vadd.f32 %v1900_v21, %v1657_v29  ;;  %v1530_v38 = vmax.f32 %v985_v30, 0.0  ;;  %v1658_v39 = vmax.f32 %v1305_v31, 0.0 }
 0x16f   : > { %v2677_v40 = vpop.f32.mrf.mxu0  ;;  %v2679_v41 = vpop.f32.mrf.mxu1 }
 0x170   : > { %v1754_v42 = vrot.slane %v1753_v36, 4  ;;  %v1902_v43 = vrot.slane %v1901_v37, 4  ;;  %v1790_v2 = vadd.f32 %v1789_v32, %v1530_v38  ;;  %v1938_v44 = vadd.f32 %v1937_v33, %v1658_v39 }
 0x171   : > { %v992_v45 = vpop.f32.mrf.mxu0  ;;  %v1312_v46 = vpop.f32.mrf.mxu1 }
 0x172   : > { %v1755_v47 = vadd.f32 %v1754_v42, %v1753_v36  ;;  %v1903_v48 = vadd.f32 %v1902_v43, %v1901_v37  ;;  %v1791_v49 = vrot.slane %v1790_v2, 4  ;;  %v1939_v50 = vrot.slane %v1938_v44, 4 }
 0x173   : > { %v994_v51 = vpop.f32.mrf.mxu0  ;;  %v1314_v52 = vpop.f32.mrf.mxu1 }
 0x174   : > { %v1756_v53 = vrot.slane %v1755_v47, 2  ;;  %v1904_v54 = vrot.slane %v1903_v48, 2  ;;  %v1792_v55 = vadd.f32 %v1791_v49, %v1790_v2  ;;  %v1940_v56 = vadd.f32 %v1939_v50, %v1938_v44 }
 0x175   : > { %v998_v57 = vpop.f32.mrf.mxu0  ;;  %v1318_v58 = vpop.f32.mrf.mxu1  ;;  %v1313_v49 = vadd.f32 %v1312_v46, %v2513_v9  ;;  %v1311_v46 = vadd.f32 %v2679_v41, %v2515_v12 }
 0x176   : > { %v1757_v59 = vadd.f32 %v1756_v53, %v1755_v47  ;;  %v1905_v60 = vadd.f32 %v1904_v54, %v1903_v48  ;;  %v1793_v61 = vrot.slane %v1792_v55, 2  ;;  %v1941_v62 = vrot.slane %v1940_v56, 2 }
 0x177   : > { %v1000_v63 = vpop.f32.mrf.mxu0  ;;  %v1320_v0 = vpop.f32.mrf.mxu1  ;;  %v1309_v47 = vadd.f32 %v2675_v35, %v2513_v9  ;;  %v993_v48 = vadd.f32 %v992_v45, %v2513_v9  ;;  %v989_v54 = vadd.f32 %v2673_v34, %v2513_v9  ;;  %v999_v35 = vadd.f32 %v998_v57, %v2513_v9 }
 0x178   : > { %v1758_v1 = vrot.slane %v1757_v59, 1  ;;  %v1906_v3 = vrot.slane %v1905_v60, 1  ;;  %v1794_v4 = vadd.f32 %v1793_v61, %v1792_v55  ;;  %v1942_v5 = vadd.f32 %v1941_v62, %v1940_v56 }
 0x179   : > { %v1002_v6 = vpop.f32.mrf.mxu0  ;;  %v1322_v7 = vpop.f32.mrf.mxu1  ;;  %v991_v55 = vadd.f32 %v2677_v40, %v2515_v12  ;;  %v995_v56 = vadd.f32 %v994_v51, %v2515_v12  ;;  %v1319_v61 = vadd.f32 %v1318_v58, %v2513_v9  ;;  %v1659_v62 = vmax.f32 %v1309_v47, 0.0 }
 0x17a   : > { %v1759_v8 = vadd.f32 %v1758_v1, %v1757_v59  ;;  %v1907_v10 = vadd.f32 %v1906_v3, %v1905_v60  ;;  %v1795_v11 = vrot.slane %v1794_v4, 1  ;;  %v1943_v13 = vrot.slane %v1942_v5, 1 }
 0x17b   : > { %v1004_v14 = vpop.f32.mrf.mxu0  ;;  %v1324_v15 = vpop.f32.mrf.mxu1  ;;  %v1315_v59 = vadd.f32 %v1314_v52, %v2515_v12  ;;  %v1533_v34 = vmax.f32 %v993_v48, 0.0  ;;  %v1661_v1 = vmax.f32 %v1313_v49, 0.0  ;;  %v1001_v40 = vadd.f32 %v1000_v63, %v2515_v12 }
 0x17c   : > { %v1796_v16 = vadd.f32 %v1795_v11, %v1794_v4  ;;  %v1944_v17 = vadd.f32 %v1943_v13, %v1942_v5  ;;  %v2683_v20 = vmul.f32 0.00390625, %v1759_v8  ;;  %v2685_v21 = vmul.f32 0.00390625, %v1907_v10 }
 0x17d   : > { %v1008_v18 = vpop.f32.mrf.mxu0  ;;  %v2681_v19 = vpop.f32.mrf.mxu1  ;;  %v1531_v52 = vmax.f32 %v989_v54, 0.0  ;;  %v1532_v57 = vmax.f32 %v991_v55, 0.0  ;;  %v1534_v4 = vmax.f32 %v995_v56, 0.0  ;;  %v1321_v5 = vadd.f32 %v1320_v0, %v2515_v12 }
 0x17e   : > { %v2687_v22 = vmul.f32 0.00390625, %v1796_v16  ;;  %v2689_v23 = vmul.f32 0.00390625, %v1944_v17  ;;  %v1662_v8 = vmax.f32 %v1315_v59, 0.0  ;;  %v1535_v10 = vmax.f32 %v999_v35, 0.0 }
 0x17f   : > { %v1010_v24 = vpop.f32.mrf.mxu0  ;;  %v2691_v25 = vpop.f32.mrf.mxu1  ;;  %v1003_v41 = vadd.f32 %v1002_v6, %v2513_v9  ;;  %v1323_v58 = vadd.f32 %v1322_v7, %v2513_v9  ;;  %v1660_v63 = vmax.f32 %v1311_v46, 0.0  ;;  %v1663_v16 = vmax.f32 %v1319_v61, 0.0 }
 0x180   : > { %v2036_v26 = vcombine.low %v2683_v20, %v2687_v22  ;;  %v2038_v27 = vcombine.low %v2685_v21, %v2689_v23  ;;  %v1005_v17 = vadd.f32 %v1004_v14, %v2515_v12  ;;  %v1325_v47 = vadd.f32 %v1324_v15, %v2515_v12 }
 0x181   : > { %v2697_v28 = vpop.f32.mrf.mxu0  ;;  %v2699_v29 = vpop.f32.mrf.mxu1  ;;  %v1797_v48 = vadd.f32 %v1533_v34, %v1531_v52  ;;  %v1945_v49 = vadd.f32 %v1661_v1, %v1659_v62  ;;  %v1536_v54 = vmax.f32 %v1001_v40, 0.0  ;;  %v1009_v0 = vadd.f32 %v1008_v18, %v2513_v9 }
 0x182   : > { %v1834_v7 = vadd.f32 %v1534_v4, %v1532_v57  ;;  %v1664_v56 = vmax.f32 %v1321_v5, 0.0  ;;  %v1329_v59 = vadd.f32 %v2681_v19, %v2513_v9  ;;  %v1011_v35 = vadd.f32 %v1010_v24, %v2515_v12 }
 0x183   : > { %v2701_v30 = vpop.f32.mrf.mxu0  ;;  %v2703_v31 = vpop.f32.mrf.mxu1  ;;  %v1982_v46 = vadd.f32 %v1662_v8, %v1660_v63  ;;  %v1798_v14 = vadd.f32 %v1797_v48, %v1535_v10  ;;  %v1537_v61 = vmax.f32 %v1003_v41, 0.0  ;;  %v1665_v15 = vmax.f32 %v1323_v58, 0.0 }
 0x184   : > { %v1946_v18 = vadd.f32 %v1945_v49, %v1663_v16  ;;  %v1538_v1 = vmax.f32 %v1005_v17, 0.0  ;;  %v1666_v40 = vmax.f32 %v1325_v47, 0.0  ;;  %v1331_v52 = vadd.f32 %v2691_v25, %v2515_v12 }
 0x185   : > { %v2705_v32 = vpop.f32.mrf.mxu0  ;;  %v2707_v33 = vpop.f32.mrf.mxu1  ;;  %v1835_v57 = vadd.f32 %v1834_v7, %v1536_v54  ;;  %v1539_v4 = vmax.f32 %v1009_v0, 0.0  ;;  %v1013_v19 = vadd.f32 %v2697_v28, %v2513_v9  ;;  %v1333_v24 = vadd.f32 %v2699_v29, %v2513_v9 }
 0x186   : > { %v1983_v10 = vadd.f32 %v1982_v46, %v1664_v56  ;;  %v1667_v41 = vmax.f32 %v1329_v59, 0.0  ;;  %v1540_v58 = vmax.f32 %v1011_v35, 0.0  ;;  %v1015_v63 = vadd.f32 %v2701_v30, %v2515_v12 }
 0x187   : > { %v2709_v36 = vpop.f32.mrf.mxu0  ;;  %v2711_v37 = vpop.f32.mrf.mxu1  ;;  %v1799_v16 = vadd.f32 %v1798_v14, %v1537_v61  ;;  %v1947_v25 = vadd.f32 %v1946_v18, %v1665_v15  ;;  %v1335_v17 = vadd.f32 %v2703_v31, %v2515_v12  ;;  %v1019_v28 = vadd.f32 %v2705_v32, %v2513_v9 }
 0x188   : > { %v1836_v48 = vadd.f32 %v1835_v57, %v1538_v1  ;;  %v1984_v49 = vadd.f32 %v1983_v10, %v1666_v40  ;;  %v1668_v54 = vmax.f32 %v1331_v52, 0.0  ;;  %v1339_v0 = vadd.f32 %v2707_v33, %v2513_v9 }
 0x189   : > { %v2713_v38 = vpop.f32.mrf.mxu0  ;;  %v2715_v39 = vpop.f32.mrf.mxu1  ;;  %v1800_v7 = vadd.f32 %v1799_v16, %v1539_v4  ;;  %v1541_v30 = vmax.f32 %v1013_v19, 0.0  ;;  %v1669_v56 = vmax.f32 %v1333_v24, 0.0  ;;  %v1021_v59 = vadd.f32 %v2709_v36, %v2515_v12 }
 0x18a   : > { %v1948_v32 = vadd.f32 %v1947_v25, %v1667_v41  ;;  %v1837_v46 = vadd.f32 %v1836_v48, %v1540_v58  ;;  %v1542_v14 = vmax.f32 %v1015_v63, 0.0  ;;  %v1341_v61 = vadd.f32 %v2711_v37, %v2515_v12 }
 0x18b   : > { %v2717_v42 = vpop.f32.mrf.mxu0  ;;  %v2719_v43 = vpop.f32.mrf.mxu1  ;;  %v1670_v15 = vmax.f32 %v1335_v17, 0.0  ;;  %v1543_v18 = vmax.f32 %v1019_v28, 0.0  ;;  %v1023_v33 = vadd.f32 %v2713_v38, %v2513_v9  ;;  %v1343_v1 = vadd.f32 %v2715_v39, %v2513_v9 }
 0x18c   : > { %v1985_v52 = vadd.f32 %v1984_v49, %v1668_v54  ;;  %v1671_v57 = vmax.f32 %v1339_v0, 0.0  ;;  %v1025_v4 = vadd.f32 %v2717_v42, %v2515_v12  ;;  %v1345_v37 = vadd.f32 %v2719_v43, %v2515_v12 }
 0x18d   : > { %v2721_v2 = vpop.f32.mrf.mxu0  ;;  %v2723_v44 = vpop.f32.mrf.mxu1  ;;  %v1801_v19 = vadd.f32 %v1800_v7, %v1541_v30  ;;  %v1949_v24 = vadd.f32 %v1948_v32, %v1669_v56  ;;  %v1544_v10 = vmax.f32 %v1021_v59, 0.0  ;;  %v1838_v58 = vadd.f32 %v1837_v46, %v1542_v14 }
 0x18e   : > { %v1029_v38 = vadd.f32 %v2721_v2, %v2513_v9  ;;  %v1672_v63 = vmax.f32 %v1341_v61, 0.0  ;;  %v1349_v16 = vadd.f32 %v2723_v44, %v2513_v9  ;;  %v1986_v25 = vadd.f32 %v1985_v52, %v1670_v15 }
 0x18f   : > { %v2729_v50 = vpop.f32.mrf.mxu0  ;;  %v2731_v53 = vpop.f32.mrf.mxu1  ;;  %v1802_v43 = vadd.f32 %v1801_v19, %v1543_v18  ;;  %v1545_v17 = vmax.f32 %v1023_v33, 0.0  ;;  %v1673_v28 = vmax.f32 %v1343_v1, 0.0  ;;  %v1950_v2 = vadd.f32 %v1949_v24, %v1671_v57 }
 0x190   : > { %v1031_v42 = vadd.f32 %v2729_v50, %v2515_v12  ;;  %v1546_v54 = vmax.f32 %v1025_v4, 0.0  ;;  %v1674_v0 = vmax.f32 %v1345_v37, 0.0  ;;  %v1351_v7 = vadd.f32 %v2731_v53, %v2515_v12 }
 0x191   : > { %v2740_v60 = vpop.f32.mrf.mxu0  ;;  %v2742_v45 = vpop.f32.mrf.mxu1  ;;  %v1839_v30 = vadd.f32 %v1838_v58, %v1544_v10  ;;  %v1547_v56 = vmax.f32 %v1029_v38, 0.0  ;;  %v1987_v46 = vadd.f32 %v1986_v25, %v1672_v63  ;;  %v1675_v14 = vmax.f32 %v1349_v16, 0.0 }
 0x192   : > { %v1033_v44 = vadd.f32 %v2740_v60, %v2513_v9  ;;  %v1353_v50 = vadd.f32 %v2742_v45, %v2513_v9  ;;  %v1548_v61 = vmax.f32 %v1031_v42, 0.0  ;;  %v1803_v18 = vadd.f32 %v1802_v43, %v1545_v17 }
 0x193   : > { %v2748_v3 = vpop.f32.mrf.mxu0  ;;  %v2750_v51 = vpop.f32.mrf.mxu1  ;;  %v1951_v53 = vadd.f32 %v1950_v2, %v1673_v28  ;;  %v1840_v52 = vadd.f32 %v1839_v30, %v1546_v54  ;;  %v1988_v57 = vadd.f32 %v1987_v46, %v1674_v0  ;;  %v1676_v4 = vmax.f32 %v1351_v7, 0.0 }
 0x194   : > { %v1035_v15 = vadd.f32 %v2748_v3, %v2515_v12  ;;  %v1355_v33 = vadd.f32 %v2750_v51, %v2515_v12  ;;  %v1804_v19 = vadd.f32 %v1803_v18, %v1547_v56  ;;  %v1549_v3 = vmax.f32 %v1033_v44, 0.0 }
 0x195   : > { %v2755_v11 = vpop.f32.mrf.mxu0  ;;  %v2757_v13 = vpop.f32.mrf.mxu1  ;;  %v1677_v24 = vmax.f32 %v1353_v50, 0.0  ;;  %v1841_v58 = vadd.f32 %v1840_v52, %v1548_v61  ;;  %v1989_v28 = vadd.f32 %v1988_v57, %v1676_v4 }
 0x196   : > { %v1039_v60 = vadd.f32 %v2755_v11, %v2513_v9  ;;  %v1359_v37 = vadd.f32 %v2757_v13, %v2513_v9  ;;  %v1952_v11 = vadd.f32 %v1951_v53, %v1675_v14  ;;  %v1550_v63 = vmax.f32 %v1035_v15, 0.0 }
 0x197   : > { %v2762_v55 = vpop.f32.mrf.mxu0  ;;  %v2764_v6 = vpop.f32.mrf.mxu1  ;;  %v1678_v42 = vmax.f32 %v1355_v33, 0.0  ;;  %v1805_v0 = vadd.f32 %v1804_v19, %v1549_v3 }
 0x198   : > { %v1041_v10 = vadd.f32 %v2762_v55, %v2515_v12  ;;  %v1361_v16 = vadd.f32 %v2764_v6, %v2515_v12  ;;  %v1551_v25 = vmax.f32 %v1039_v60, 0.0  ;;  %v1679_v2 = vmax.f32 %v1359_v37, 0.0 }
 0x199   : > { %v2769_v34 = vpop.f32.mrf.mxu0  ;;  %v2771_v62 = vpop.f32.mrf.mxu1  ;;  %v1953_v7 = vadd.f32 %v1952_v11, %v1677_v24  ;;  %v1842_v44 = vadd.f32 %v1841_v58, %v1550_v63  ;;  %v1990_v14 = vadd.f32 %v1989_v28, %v1678_v42 }
 0x19a   : > { %v1043_v13 = vadd.f32 %v2769_v34, %v2513_v9  ;;  %v1363_v43 = vadd.f32 %v2771_v62, %v2513_v9  ;;  %v1552_v30 = vmax.f32 %v1041_v10, 0.0  ;;  %v1680_v50 = vmax.f32 %v1361_v16, 0.0 }
 0x19b   : > { %v2779_v5 = vpop.f32.mrf.mxu0  ;;  %v2781_v8 = vpop.f32.mrf.mxu1 }
 0x19c   : > { %v1045_v54 = vadd.f32 %v2779_v5, %v2515_v12  ;;  %v1365_v6 = vadd.f32 %v2781_v8, %v2515_v12  ;;  %v1806_v8 = vadd.f32 %v1805_v0, %v1551_v25  ;;  %v1553_v61 = vmax.f32 %v1043_v13, 0.0 }
 0x19d   : > { %v2789_v47 = vpop.f32.mrf.mxu0  ;;  %v2791_v29 = vpop.f32.mrf.mxu1  ;;  %v1681_v15 = vmax.f32 %v1363_v43, 0.0  ;;  %v1843_v57 = vadd.f32 %v1842_v44, %v1552_v30  ;;  %v1991_v3 = vadd.f32 %v1990_v14, %v1680_v50 }
 0x19e   : > { %v1049_v34 = vadd.f32 %v2789_v47, %v2513_v9  ;;  %v1369_v46 = vadd.f32 %v2791_v29, %v2513_v9  ;;  %v1954_v47 = vadd.f32 %v1953_v7, %v1679_v2  ;;  %v1554_v33 = vmax.f32 %v1045_v54, 0.0 }
 0x19f   : > { %v2797_v31 = vpop.f32.mrf.mxu0  ;;  %v2799_v35 = vpop.f32.mrf.mxu1  ;;  %v1682_v60 = vmax.f32 %v1365_v6, 0.0  ;;  %v1807_v58 = vadd.f32 %v1806_v8, %v1553_v61 }
 0x1a0   : > { %v1051_v5 = vadd.f32 %v2797_v31, %v2515_v12  ;;  %v1371_v52 = vadd.f32 %v2799_v35, %v2515_v12  ;;  %v1555_v4 = vmax.f32 %v1049_v34, 0.0  ;;  %v1683_v24 = vmax.f32 %v1369_v46, 0.0 }
 0x1a1   : > { %v2807_v40 = vpop.f32.mrf.mxu0  ;;  %v2809_v36 = vpop.f32.mrf.mxu1  ;;  %v1955_v35 = vadd.f32 %v1954_v47, %v1681_v15  ;;  %v1844_v42 = vadd.f32 %v1843_v57, %v1554_v33  ;;  %v1992_v25 = vadd.f32 %v1991_v3, %v1682_v60 }
 0x1a2   : > { %v1053_v29 = vadd.f32 %v2807_v40, %v2513_v9  ;;  %v1373_v31 = vadd.f32 %v2809_v36, %v2513_v9  ;;  %v1556_v10 = vmax.f32 %v1051_v5, 0.0  ;;  %v1684_v13 = vmax.f32 %v1371_v52, 0.0 }
 0x1a3   : > { %v2817_v41 = vpop.f32.mrf.mxu0  ;;  %v2819_v39 = vpop.f32.mrf.mxu1  ;;  %v1808_v28 = vadd.f32 %v1807_v58, %v1555_v4  ;;  %v1956_v0 = vadd.f32 %v1955_v35, %v1683_v24 }
 0x1a4   : > { %v1055_v11 = vadd.f32 %v2817_v41, %v2515_v12  ;;  %v1375_v63 = vadd.f32 %v2819_v39, %v2515_v12  ;;  %v1557_v2 = vmax.f32 %v1053_v29, 0.0  ;;  %v1685_v41 = vmax.f32 %v1373_v31, 0.0 }
 0x1a5   : > { %v2825_v48 = vpop.f32.mrf.mxu0  ;;  %v2827_v49 = vpop.f32.mrf.mxu1 }
 0x1a6   : > { %v1059_v40 = vadd.f32 %v2825_v48, %v2513_v9  ;;  %v1379_v43 = vadd.f32 %v2827_v49, %v2513_v9  ;;  %v1845_v48 = vadd.f32 %v1844_v42, %v1556_v10  ;;  %v1558_v7 = vmax.f32 %v1055_v11, 0.0 }
 0x1a7   : > { %v2835_v59 = vpop.f32.mrf.mxu0  ;;  %v2837_v32 = vpop.f32.mrf.mxu1  ;;  %v1686_v34 = vmax.f32 %v1375_v63, 0.0  ;;  %v1809_v15 = vadd.f32 %v1808_v28, %v1557_v2 }
 0x1a8   : > { %v1061_v54 = vadd.f32 %v2835_v59, %v2515_v12  ;;  %v1381_v30 = vadd.f32 %v2837_v32, %v2515_v12  ;;  %v1559_v44 = vmax.f32 %v1059_v40, 0.0  ;;  %v1993_v59 = vadd.f32 %v1992_v25, %v1684_v13 }
 0x1a9   : > { %v2845_v1 = vpop.f32.mrf.mxu0  ;;  %v2847_v45 = vpop.f32.mrf.mxu1  ;;  %v1687_v14 = vmax.f32 %v1379_v43, 0.0  ;;  %v1957_v32 = vadd.f32 %v1956_v0, %v1685_v41  ;;  %v1846_v52 = vadd.f32 %v1845_v48, %v1558_v7 }
 0x1aa   : > { %v1063_v49 = vadd.f32 %v2845_v1, %v2513_v9  ;;  %v1383_v50 = vadd.f32 %v2847_v45, %v2513_v9  ;;  %v1560_v47 = vmax.f32 %v1061_v54, 0.0  ;;  %v1688_v45 = vmax.f32 %v1381_v30, 0.0 }
 0x1ab   : > { %v2853_v51 = vpop.f32.mrf.mxu0  ;;  %v2855_v38 = vpop.f32.mrf.mxu1  ;;  %v1810_v29 = vadd.f32 %v1809_v15, %v1559_v44  ;;  %v1958_v10 = vadd.f32 %v1957_v32, %v1687_v14 }
 0x1ac   : > { %v1065_v8 = vadd.f32 %v2853_v51, %v2515_v12  ;;  %v1385_v61 = vadd.f32 %v2855_v38, %v2515_v12  ;;  %v1994_v51 = vadd.f32 %v1993_v59, %v1686_v34  ;;  %v1561_v31 = vmax.f32 %v1063_v49, 0.0 }
 0x1ad   : > { %v2863_v17 = vpop.f32.mrf.mxu0  ;;  %v2865_v55 = vpop.f32.mrf.mxu1  ;;  %v1689_v38 = vmax.f32 %v1383_v50, 0.0  ;;  %v1847_v35 = vadd.f32 %v1846_v52, %v1560_v47 }
 0x1ae   : > { %v1069_v33 = vadd.f32 %v2863_v17, %v2513_v9  ;;  %v1389_v57 = vadd.f32 %v2865_v55, %v2513_v9  ;;  %v1562_v11 = vmax.f32 %v1065_v8, 0.0  ;;  %v1690_v58 = vmax.f32 %v1385_v61, 0.0 }
 0x1af   : > { %v2873_v56 = vpop.f32.mrf.mxu0  ;;  %v2875_v62 = vpop.f32.mrf.mxu1  ;;  %v1995_v25 = vadd.f32 %v1994_v51, %v1688_v45  ;;  %v1811_v2 = vadd.f32 %v1810_v29, %v1561_v31  ;;  %v1959_v41 = vadd.f32 %v1958_v10, %v1689_v38 }
 0x1b0   : > { %v1071_v4 = vadd.f32 %v2873_v56, %v2515_v12  ;;  %v1391_v17 = vadd.f32 %v2875_v62, %v2515_v12  ;;  %v1563_v63 = vmax.f32 %v1069_v33, 0.0  ;;  %v1691_v13 = vmax.f32 %v1389_v57, 0.0 }
 0x1b1   : > { %v2881_v18 = vpop.f32.mrf.mxu0  ;;  %v2883_v53 = vpop.f32.mrf.mxu1  ;;  %v1848_v48 = vadd.f32 %v1847_v35, %v1562_v11  ;;  %v1996_v7 = vadd.f32 %v1995_v25, %v1690_v58 }
 0x1b2   : > { %v1073_v55 = vadd.f32 %v2881_v18, %v2513_v9  ;;  %v1393_v56 = vadd.f32 %v2883_v53, %v2513_v9  ;;  %v1564_v43 = vmax.f32 %v1071_v4, 0.0  ;;  %v1692_v53 = vmax.f32 %v1391_v17, 0.0 }
 0x1b3   : > { %v2891_v37 = vpop.f32.mrf.mxu0  ;;  %v2893_v19 = vpop.f32.mrf.mxu1  ;;  %v1812_v34 = vadd.f32 %v1811_v2, %v1563_v63  ;;  %v1960_v14 = vadd.f32 %v1959_v41, %v1691_v13 }
 0x1b4   : > { %v1075_v28 = vadd.f32 %v2891_v37, %v2515_v12  ;;  %v1395_v62 = vadd.f32 %v2893_v19, %v2515_v12  ;;  %v1565_v44 = vmax.f32 %v1073_v55, 0.0  ;;  %v1693_v49 = vmax.f32 %v1393_v56, 0.0 }
 0x1b5   : > { %v1078_v16 = vpop.f32.mrf.mxu0  ;;  %v2901_v36 = vpop.f32.mrf.mxu1  ;;  %v1849_v8 = vadd.f32 %v1848_v48, %v1564_v43  ;;  %v1997_v52 = vadd.f32 %v1996_v7, %v1692_v53 }
 0x1b6   : > { %v1079_v54 = vadd.f32 %v1078_v16, %v2513_v9  ;;  %v1399_v30 = vadd.f32 %v2901_v36, %v2513_v9  ;;  %v1566_v19 = vmax.f32 %v1075_v28, 0.0  ;;  %v1694_v61 = vmax.f32 %v1395_v62, 0.0 }
 0x1b7   : > { %v1080_v6 = vpop.f32.mrf.mxu0  ;;  %v2907_v39 = vpop.f32.mrf.mxu1  ;;  %v1813_v4 = vadd.f32 %v1812_v34, %v1565_v44  ;;  %v1961_v51 = vadd.f32 %v1960_v14, %v1693_v49 }
 0x1b8   : > { %v1081_v37 = vadd.f32 %v1080_v6, %v2515_v12  ;;  %v1401_v16 = vadd.f32 %v2907_v39, %v2515_v12  ;;  %v1567_v15 = vmax.f32 %v1079_v54, 0.0  ;;  %v1695_v45 = vmax.f32 %v1399_v30, 0.0 }
 0x1b9   : > { %v1082_v46 = vpop.f32.mrf.mxu0  ;;  %v1402_v5 = vpop.f32.mrf.mxu1  ;;  %v1850_v10 = vadd.f32 %v1849_v8, %v1566_v19  ;;  %v1998_v58 = vadd.f32 %v1997_v52, %v1694_v61 }
 0x1ba   : > { %v1083_v32 = vadd.f32 %v1082_v46, %v2513_v9  ;;  %v1403_v47 = vadd.f32 %v1402_v5, %v2513_v9  ;;  %v1568_v29 = vmax.f32 %v1081_v37, 0.0  ;;  %v1696_v11 = vmax.f32 %v1401_v16, 0.0 }
 0x1bb   : > { %v1084_v1 = vpop.f32.mrf.mxu0  ;;  %v1404_v60 = vpop.f32.mrf.mxu1  ;;  %v1814_v17 = vadd.f32 %v1813_v4, %v1567_v15 }
 0x1bc   : > { %v1085_v6 = vadd.f32 %v1084_v1, %v2515_v12  ;;  %v1405_v57 = vadd.f32 %v1404_v60, %v2515_v12  ;;  %v1569_v35 = vmax.f32 %v1083_v32, 0.0  ;;  %v1697_v63 = vmax.f32 %v1403_v47, 0.0 }
 0x1bd   : > { %v1088_v3 = vpop.f32.mrf.mxu0  ;;  %v1408_v24 = vpop.f32.mrf.mxu1  ;;  %v1962_v60 = vadd.f32 %v1961_v51, %v1695_v45 }
 0x1be   : > { %v1089_v31 = vadd.f32 %v1088_v3, %v2513_v9  ;;  %v1409_v46 = vadd.f32 %v1408_v24, %v2513_v9  ;;  %v1570_v56 = vmax.f32 %v1085_v6, 0.0  ;;  %v1698_v25 = vmax.f32 %v1405_v57, 0.0 }
 0x1bf   : > { %v1090_v40 = vpop.f32.mrf.mxu0  ;;  %v1410_v42 = vpop.f32.mrf.mxu1  ;;  %v1851_v3 = vadd.f32 %v1850_v10, %v1568_v29  ;;  %v1815_v7 = vadd.f32 %v1814_v17, %v1569_v35  ;;  %v1963_v53 = vadd.f32 %v1962_v60, %v1697_v63 }
 0x1c0   : > { %v1091_v5 = vadd.f32 %v1090_v40, %v2515_v12  ;;  %v1411_v13 = vadd.f32 %v1410_v42, %v2515_v12  ;;  %v1571_v43 = vmax.f32 %v1089_v31, 0.0  ;;  %v1999_v40 = vadd.f32 %v1998_v58, %v1696_v11 }
 0x1c1   : > { %v1092_v0 = vpop.f32.mrf.mxu0  ;;  %v1412_v18 = vpop.f32.mrf.mxu1  ;;  %v1699_v62 = vmax.f32 %v1409_v46, 0.0  ;;  %v1852_v49 = vadd.f32 %v1851_v3, %v1570_v56 }
 0x1c2   : > { %v1093_v28 = vadd.f32 %v1092_v0, %v2513_v9  ;;  %v1413_v2 = vadd.f32 %v1412_v18, %v2513_v9  ;;  %v1572_v54 = vmax.f32 %v1091_v5, 0.0  ;;  %v2000_v37 = vadd.f32 %v1999_v40, %v1698_v25 }
 0x1c3   : > { %v1094_v50 = vpop.f32.mrf.mxu0  ;;  %v1414_v59 = vpop.f32.mrf.mxu1  ;;  %v1700_v0 = vmax.f32 %v1411_v13, 0.0  ;;  %v1816_v14 = vadd.f32 %v1815_v7, %v1571_v43  ;;  %v1964_v15 = vadd.f32 %v1963_v53, %v1699_v62 }
 0x1c4   : > { %v1095_v48 = vadd.f32 %v1094_v50, %v2515_v12  ;;  %v1415_v30 = vadd.f32 %v1414_v59, %v2515_v12  ;;  %v1573_v8 = vmax.f32 %v1093_v28, 0.0  ;;  %v1701_v19 = vmax.f32 %v1413_v2, 0.0 }
 0x1c5   : > { %v1098_v36 = vpop.f32.mrf.mxu0  ;;  %v1418_v33 = vpop.f32.mrf.mxu1  ;;  %v1853_v32 = vadd.f32 %v1852_v49, %v1572_v54  ;;  %v2001_v4 = vadd.f32 %v2000_v37, %v1700_v0 }
 0x1c6   : > { %v1099_v34 = vadd.f32 %v1098_v36, %v2513_v9  ;;  %v1419_v18 = vadd.f32 %v1418_v33, %v2513_v9  ;;  %v1574_v47 = vmax.f32 %v1095_v48, 0.0  ;;  %v1702_v36 = vmax.f32 %v1415_v30, 0.0 }
 0x1c7   : > { %v1100_v39 = vpop.f32.mrf.mxu0  ;;  %v1420_v38 = vpop.f32.mrf.mxu1  ;;  %v1965_v10 = vadd.f32 %v1964_v15, %v1701_v19 }
 0x1c8   : > { %v1101_v16 = vadd.f32 %v1100_v39, %v2515_v12  ;;  %v1421_v59 = vadd.f32 %v1420_v38, %v2515_v12  ;;  %v1575_v52 = vmax.f32 %v1099_v34, 0.0  ;;  %v1703_v51 = vmax.f32 %v1419_v18, 0.0 }
 0x1c9   : > { %v1102_v1 = vpop.f32.mrf.mxu0  ;;  %v1422_v55 = vpop.f32.mrf.mxu1  ;;  %v1817_v39 = vadd.f32 %v1816_v14, %v1573_v8  ;;  %v1854_v58 = vadd.f32 %v1853_v32, %v1574_v47 }
 0x1ca   : > { %v1103_v45 = vadd.f32 %v1102_v1, %v2513_v9  ;;  %v1423_v6 = vadd.f32 %v1422_v55, %v2513_v9  ;;  %v1576_v11 = vmax.f32 %v1101_v16, 0.0  ;;  %v1704_v17 = vmax.f32 %v1421_v59, 0.0 }
 0x1cb   : > { %v1104_v24 = vpop.f32.mrf.mxu0  ;;  %v1424_v41 = vpop.f32.mrf.mxu1  ;;  %v2002_v1 = vadd.f32 %v2001_v4, %v1702_v36  ;;  %v1818_v55 = vadd.f32 %v1817_v39, %v1575_v52  ;;  %v1966_v3 = vadd.f32 %v1965_v10, %v1703_v51 }
 0x1cc   : > { %v1105_v29 = vadd.f32 %v1104_v24, %v2515_v12  ;;  %v1425_v31 = vadd.f32 %v1424_v41, %v2515_v12  ;;  %v1577_v60 = vmax.f32 %v1103_v45, 0.0  ;;  %v1705_v56 = vmax.f32 %v1423_v6, 0.0 }
 0x1cd   : > { %v1108_v42 = vpop.f32.mrf.mxu0  ;;  %v1428_v44 = vpop.f32.mrf.mxu1  ;;  %v1855_v24 = vadd.f32 %v1854_v58, %v1576_v11  ;;  %v2003_v7 = vadd.f32 %v2002_v1, %v1704_v17 }
 0x1ce   : > { %v1109_v46 = vadd.f32 %v1108_v42, %v2513_v9  ;;  %v1429_v35 = vadd.f32 %v1428_v44, %v2513_v9  ;;  %v1578_v43 = vmax.f32 %v1105_v29, 0.0  ;;  %v1706_v28 = vmax.f32 %v1425_v31, 0.0 }
 0x1cf   : > { %v1110_v61 = vpop.f32.mrf.mxu0  ;;  %v1430_v50 = vpop.f32.mrf.mxu1  ;;  %v1819_v42 = vadd.f32 %v1818_v55, %v1577_v60  ;;  %v1967_v44 = vadd.f32 %v1966_v3, %v1705_v56 }
 0x1d0   : > { %v1111_v63 = vadd.f32 %v1110_v61, %v2515_v12  ;;  %v1431_v2 = vadd.f32 %v1430_v50, %v2515_v12  ;;  %v1579_v41 = vmax.f32 %v1109_v46, 0.0  ;;  %v1707_v53 = vmax.f32 %v1429_v35, 0.0 }
 0x1d1   : > { %v1112_v57 = vpop.f32.mrf.mxu0  ;;  %v1432_v33 = vpop.f32.mrf.mxu1  ;;  %v1856_v14 = vadd.f32 %v1855_v24, %v1578_v43  ;;  %v2004_v8 = vadd.f32 %v2003_v7, %v1706_v28 }
 0x1d2   : > { %v1113_v40 = vadd.f32 %v1112_v57, %v2513_v9  ;;  %v1433_v62 = vadd.f32 %v1432_v33, %v2513_v9  ;;  %v1580_v30 = vmax.f32 %v1111_v63, 0.0  ;;  %v1708_v19 = vmax.f32 %v1431_v2, 0.0 }
 0x1d3   : > { %v1114_v38 = vpop.f32.mrf.mxu0  ;;  %v1434_v5 = vpop.f32.mrf.mxu1  ;;  %v1820_v61 = vadd.f32 %v1819_v42, %v1579_v41  ;;  %v1968_v36 = vadd.f32 %v1967_v44, %v1707_v53 }
 0x1d4   : > { %v1115_v34 = vadd.f32 %v1114_v38, %v2515_v12  ;;  %v1435_v49 = vadd.f32 %v1434_v5, %v2515_v12  ;;  %v1581_v50 = vmax.f32 %v1113_v40, 0.0  ;;  %v1709_v15 = vmax.f32 %v1433_v62, 0.0 }
 0x1d5   : > { %v1118_v25 = vpop.f32.mrf.mxu0  ;;  %v1438_v13 = vpop.f32.mrf.mxu1  ;;  %v1857_v52 = vadd.f32 %v1856_v14, %v1580_v30  ;;  %v2005_v39 = vadd.f32 %v2004_v8, %v1708_v19 }
 0x1d6   : > { %v1119_v37 = vadd.f32 %v1118_v25, %v2513_v9  ;;  %v1439_v16 = vadd.f32 %v1438_v13, %v2513_v9  ;;  %v1582_v45 = vmax.f32 %v1115_v34, 0.0  ;;  %v1710_v57 = vmax.f32 %v1435_v49, 0.0 }
 0x1d7   : > { %v1120_v54 = vpop.f32.mrf.mxu0  ;;  %v1440_v48 = vpop.f32.mrf.mxu1  ;;  %v1821_v38 = vadd.f32 %v1820_v61, %v1581_v50  ;;  %v1969_v5 = vadd.f32 %v1968_v36, %v1709_v15 }
 0x1d8   : > { %v1121_v32 = vadd.f32 %v1120_v54, %v2515_v12  ;;  %v1441_v6 = vadd.f32 %v1440_v48, %v2515_v12  ;;  %v1583_v33 = vmax.f32 %v1119_v37, 0.0  ;;  %v1711_v10 = vmax.f32 %v1439_v16, 0.0 }
 0x1d9   : > { %v1122_v0 = vpop.f32.mrf.mxu0  ;;  %v1442_v18 = vpop.f32.mrf.mxu1  ;;  %v1858_v1 = vadd.f32 %v1857_v52, %v1582_v45  ;;  %v2006_v25 = vadd.f32 %v2005_v39, %v1710_v57 }
 0x1da   : > { %v1123_v4 = vadd.f32 %v1122_v0, %v2513_v9  ;;  %v1443_v51 = vadd.f32 %v1442_v18, %v2513_v9  ;;  %v1584_v58 = vmax.f32 %v1121_v32, 0.0  ;;  %v1712_v55 = vmax.f32 %v1441_v6, 0.0 }
 0x1db   : > { %v1124_v47 = vpop.f32.mrf.mxu0  ;;  %v1444_v59 = vpop.f32.mrf.mxu1  ;;  %v1822_v13 = vadd.f32 %v1821_v38, %v1583_v33  ;;  %v1970_v24 = vadd.f32 %v1969_v5, %v1711_v10 }
 0x1dc   : > { %v1125_v11 = vadd.f32 %v1124_v47, %v2515_v12  ;;  %v1445_v46 = vadd.f32 %v1444_v59, %v2515_v12  ;;  %v1585_v3 = vmax.f32 %v1123_v4, 0.0  ;;  %v1713_v43 = vmax.f32 %v1443_v51, 0.0 }
 0x1dd   : > { %v1128_v29 = vpop.f32.mrf.mxu0  ;;  %v1448_v31 = vpop.f32.mrf.mxu1  ;;  %v1859_v54 = vadd.f32 %v1858_v1, %v1584_v58  ;;  %v2007_v42 = vadd.f32 %v2006_v25, %v1712_v55 }
 0x1de   : > { %v1129_v17 = vadd.f32 %v1128_v29, %v2513_v9  ;;  %v1449_v60 = vadd.f32 %v1448_v31, %v2513_v9  ;;  %v1586_v41 = vmax.f32 %v1125_v11, 0.0  ;;  %v1714_v40 = vmax.f32 %v1445_v46, 0.0 }
 0x1df   : > { %v1130_v35 = vpop.f32.mrf.mxu0  ;;  %v1450_v63 = vpop.f32.mrf.mxu1  ;;  %v1823_v0 = vadd.f32 %v1822_v13, %v1585_v3  ;;  %v1971_v18 = vadd.f32 %v1970_v24, %v1713_v43 }
 0x1e0   : > { %v1131_v56 = vadd.f32 %v1130_v35, %v2515_v12  ;;  %v1587_v48 = vmax.f32 %v1129_v17, 0.0  ;;  %v1451_v7 = vadd.f32 %v1450_v63, %v2515_v12  ;;  %v1715_v44 = vmax.f32 %v1449_v60, 0.0 }
 0x1e1   : > { %v1132_v28 = vpop.f32.mrf.mxu0  ;;  %v1452_v2 = vpop.f32.mrf.mxu1  ;;  %v1860_v61 = vadd.f32 %v1859_v54, %v1586_v41  ;;  %v2008_v50 = vadd.f32 %v2007_v42, %v1714_v40 }
 0x1e2   : > { %v1133_v62 = vadd.f32 %v1132_v28, %v2513_v9  ;;  %v1453_v53 = vadd.f32 %v1452_v2, %v2513_v9  ;;  %v1588_v49 = vmax.f32 %v1131_v56, 0.0  ;;  %v1824_v47 = vadd.f32 %v1823_v0, %v1587_v48 }
 0x1e3   : > { %v1134_v30 = vpop.f32.mrf.mxu0  ;;  %v1454_v34 = vpop.f32.mrf.mxu1  ;;  %v1716_v59 = vmax.f32 %v1451_v7, 0.0  ;;  %v1972_v57 = vadd.f32 %v1971_v18, %v1715_v44 }
 0x1e4   : > { %v1135_v37 = vadd.f32 %v1134_v30, %v2515_v12  ;;  %v1589_v14 = vmax.f32 %v1133_v62, 0.0  ;;  %v1455_v8 = vadd.f32 %v1454_v34, %v2515_v12  ;;  %v1717_v15 = vmax.f32 %v1453_v53, 0.0 }
 0x1e5   : > { %v1138_v19 = vpop.f32.mrf.mxu0  ;;  %v1458_v16 = vpop.f32.mrf.mxu1  ;;  %v1861_v33 = vadd.f32 %v1860_v61, %v1588_v49  ;;  %v2009_v35 = vadd.f32 %v2008_v50, %v1716_v59 }
 0x1e6   : > { %v1139_v32 = vadd.f32 %v1138_v19, %v2513_v9  ;;  %v1590_v36 = vmax.f32 %v1135_v37, 0.0  ;;  %v1459_v52 = vadd.f32 %v1458_v16, %v2513_v9  ;;  %v1825_v29 = vadd.f32 %v1824_v47, %v1589_v14 }
 0x1e7   : > { %v1140_v45 = vpop.f32.mrf.mxu0  ;;  %v1460_v6 = vpop.f32.mrf.mxu1  ;;  %v1718_v31 = vmax.f32 %v1455_v8, 0.0  ;;  %v1973_v38 = vadd.f32 %v1972_v57, %v1717_v15 }
 0x1e8   : > { %v1591_v4 = vmax.f32 %v1139_v32, 0.0  ;;  %v1141_v51 = vadd.f32 %v1140_v45, %v2515_v12  ;;  %v1719_v39 = vmax.f32 %v1459_v52, 0.0  ;;  %v1461_v10 = vadd.f32 %v1460_v6, %v2515_v12 }
 0x1e9   : > { %v1142_v11 = vpop.f32.mrf.mxu0  ;;  %v1462_v46 = vpop.f32.mrf.mxu1  ;;  %v1862_v63 = vadd.f32 %v1861_v33, %v1590_v36  ;;  %v2010_v28 = vadd.f32 %v2009_v35, %v1718_v31 }
 0x1ea   : > { %v1592_v5 = vmax.f32 %v1141_v51, 0.0  ;;  %v1143_v58 = vadd.f32 %v1142_v11, %v2513_v9  ;;  %v1463_v17 = vadd.f32 %v1462_v46, %v2513_v9  ;;  %v1826_v1 = vadd.f32 %v1825_v29, %v1591_v4 }
 0x1eb   : > { %v1720_v55 = vmax.f32 %v1461_v10, 0.0  ;;  %v1144_v60 = vpop.f32.mrf.mxu0  ;;  %v1464_v56 = vpop.f32.mrf.mxu1  ;;  %v1974_v25 = vadd.f32 %v1973_v38, %v1719_v39  ;;  %v2045_v10 = vrot.slane %v2038_v27, 6 }
 0x1ec   : > { %v1593_v13 = vmax.f32 %v1143_v58, 0.0  ;;  %v1721_v3 = vmax.f32 %v1463_v17, 0.0  ;;  %v1145_v43 = vadd.f32 %v1144_v60, %v2515_v12  ;;  %v1465_v2 = vadd.f32 %v1464_v56, %v2515_v12 }
 0x1ed   : > { %v1863_v24 = vadd.f32 %v1862_v63, %v1592_v5  ;;  %v2011_v54 = vadd.f32 %v2010_v28, %v1720_v55 }
 0x1ee   : > { %v1827_v41 = vadd.f32 %v1826_v1, %v1593_v13  ;;  %v1975_v40 = vadd.f32 %v1974_v25, %v1721_v3  ;;  %v1594_v62 = vmax.f32 %v1145_v43, 0.0  ;;  %v1722_v9 = vmax.f32 %v1465_v2, 0.0 }
 0x1f0   : > { %v1828_v48 = vrot.slane %v1827_v41, 4  ;;  %v1976_v7 = vrot.slane %v1975_v40, 4  ;;  %v1864_v53 = vadd.f32 %v1863_v24, %v1594_v62  ;;  %v2012_v30 = vadd.f32 %v2011_v54, %v1722_v9 }
 0x1f2   : > { %v1829_v34 = vadd.f32 %v1828_v48, %v1827_v41  ;;  %v1977_v42 = vadd.f32 %v1976_v7, %v1975_v40  ;;  %v1865_v44 = vrot.slane %v1864_v53, 4  ;;  %v2013_v49 = vrot.slane %v2012_v30, 4 }
 0x1f4   : > { %v1830_v37 = vrot.slane %v1829_v34, 2  ;;  %v1978_v0 = vrot.slane %v1977_v42, 2  ;;  %v1866_v18 = vadd.f32 %v1865_v44, %v1864_v53  ;;  %v2014_v14 = vadd.f32 %v2013_v49, %v2012_v30 }
 0x1f6   : > { %v1831_v12 = vadd.f32 %v1830_v37, %v1829_v34  ;;  %v1979_v8 = vadd.f32 %v1978_v0, %v1977_v42  ;;  %v1867_v19 = vrot.slane %v1866_v18, 2  ;;  %v2015_v16 = vrot.slane %v2014_v14, 2 }
 0x1f8   : > { %v1832_v61 = vrot.slane %v1831_v12, 1  ;;  %v1980_v50 = vrot.slane %v1979_v8, 1  ;;  %v1868_v15 = vadd.f32 %v1867_v19, %v1866_v18  ;;  %v2016_v32 = vadd.f32 %v2015_v16, %v2014_v14 }
 0x1fa   : > { %v1833_v47 = vadd.f32 %v1832_v61, %v1831_v12  ;;  %v1869_v59 = vrot.slane %v1868_v15, 1  ;;  %v1981_v36 = vadd.f32 %v1980_v50, %v1979_v8  ;;  %v2017_v52 = vrot.slane %v2016_v32, 1 }
 0x1fc   : > { %v1870_v45 = vadd.f32 %v1869_v59, %v1868_v15  ;;  %v2018_v6 = vadd.f32 %v2017_v52, %v2016_v32  ;;  %v2022_v57 = vmul.f32 0.00390625, %v1833_v47  ;;  %v2026_v4 = vmul.f32 0.00390625, %v1981_v36 }
 0x1fe   : > { %v2023_v33 = vmul.f32 0.00390625, %v1870_v45  ;;  %v2027_v51 = vmul.f32 0.00390625, %v2018_v6 }
 0x200   : > { %v2037_v29 = vcombine.low %v2022_v57, %v2023_v33  ;;  %v2039_v31 = vcombine.low %v2026_v4, %v2027_v51 }
 0x202   : > { %v2040_v39 = vrot.slane %v2037_v29, 7  ;;  %v2050_v5 = vrot.slane %v2039_v31, 5 }
 0x204   : > { %v2042_v11 = vsel %vm2041_vm0, %v2040_v39, %v2036_v26 }
 0x205   : > { %v2044_v46 = vsel %vm2043_vm1, %v2040_v39, %v2042_v11 }
 0x206   : > { %v2047_v38 = vsel %vm2046_vm2, %v2045_v10, %v2044_v46 }
 0x207   : > { %v2049_v58 = vsel %vm2048_vm3, %v2045_v10, %v2047_v38 }
 0x208   : > { %v2052_v17 = vsel %vm2051_vm4, %v2050_v5, %v2049_v58 }
 0x209   : > { %v2054_v35 = vsel %vm2053_vm5, %v2050_v5, %v2052_v17 }
 0x20a   : > { %2056 = vst [vmem:[%s172_s4] sm:$0xff] %v2054_v35 }
 0x20b PF: > { %s13_s12 = sadd.s32 1, %s2323_s12  }
 0x20c   : > { %p10_p5 = scmp.ge.s32.totalorder %s13_s12, 4  }
 0x20e   :  { %12 = sbr.rel (!%p10_p5) target bundleno = 1 (0x1), region = 62 }

</bundles_post_ra>
